<compile_context>
chip_gen: v7x
topology: tpu7x:2x2x1
jax: 0.10.0
libtpu: 0.0.40
codegen_flags: <defaults>
</compile_context>

<pallas_src>
import jax
import jax.numpy as jnp
from jax.experimental import pallas as pl
from jax.experimental.pallas import tpu as pltpu

NEG_SLOPE = 0.01
PAD = 128          # lane-padded feature width shared by every layer slot
N_NODES = 8        # number of graph nodes (sublane-aligned)
IN_CHANNELS = 4

# --- original (unfolded) module schedule: 3 GCN enc + 2 Linear + 2 Linear + 3 GCN dec ---
LAYER_KIND = ("gcn", "gcn", "gcn",          # encoder
              "lin", "lin",                 # fc_latent
              "lin", "lin",                 # fc_decoder
              "gcn", "gcn", "gcn")          # decoder
LAYER_ACT = ("leaky", "leaky", "leaky",
             "leaky", "none",
             "leaky", "leaky",
             "leaky", "leaky", "leaky_tanh")
LAYER_SHAPES = ((IN_CHANNELS, 64), (64, 128), (128, 64),
                (64, 32), (32, 3),
                (3, 32), (32, 64),
                (64, 128), (128, 64), (64, IN_CHANNELS))
N_LAYERS = len(LAYER_KIND)

# --- fused schedule executed by the kernel: layers 4 (32->3, none) and 5 (3->32, leaky)
# --- are algebraically folded into a single 32->32 Linear with act "leaky".
FUSED_KIND = ("gcn", "gcn", "gcn",
              "lin", "lin", "lin",
              "gcn", "gcn", "gcn")
FUSED_ACT = ("leaky", "leaky", "leaky",
             "leaky", "leaky", "leaky",
             "leaky", "leaky", "leaky_tanh")
N_FUSED = len(FUSED_KIND)


def _leaky(x):
    # max(x, 0.01*x) == LeakyReLU(0.01); one VPU max instead of compare+select
    return jnp.maximum(x, NEG_SLOPE * x)


def _vmem_spec():
    return pl.BlockSpec(memory_space=pltpu.MemorySpace.VMEM)


# ------------------------------- fused kernel ------------------------------ #
def _fused_forward_kernel(x_ref, a_ref, b_ref, w_hbm, o_ref, wbuf, sem, h_ref):
    """Entire GCCNLinear forward (folded 9-layer schedule), activation kept on-chip."""
    # Issue all per-layer weight DMAs up front (HBM -> VMEM, 32 KiB each); compute of
    # layer 0 hides the tail of the stream, only the first copy's latency is exposed.
    copies = [
        pltpu.make_async_copy(w_hbm.at[i], wbuf.at[i], sem.at[i])
        for i in range(N_FUSED)
    ]
    for c in copies:
        c.start()

    # In-kernel zero-pad of the (N, IN_CHANNELS) input to the (N, PAD) lane width.
    h_ref[...] = jnp.zeros_like(h_ref)
    h_ref[:, :IN_CHANNELS] = x_ref[...]
    h = h_ref[...]                              # (N, PAD) f32

    a = a_ref[...]                              # (N, N) f32, reused by all 6 GCN layers

    for i in range(N_FUSED):                    # static Python unroll (layer list fixed)
        copies[i].wait()                        # just-in-time wait for layer i weights
        w = wbuf[i]                             # (PAD, PAD) bf16
        t = jnp.dot(h.astype(jnp.bfloat16), w, preferred_element_type=jnp.float32)
        if FUSED_KIND[i] == "gcn":
            # aggregation stays in f32 (no extra bf16 re-rounding of the intermediate)
            t = jnp.dot(a, t, preferred_element_type=jnp.float32)
        y = t + b_ref[i]                        # f32 bias add
        if FUSED_ACT[i] != "none":
            y = _leaky(y)
        if FUSED_ACT[i] == "leaky_tanh":
            y = jnp.tanh(y)
        h = y                                   # padded lanes stay exactly 0 throughout

    # global_max_pool with batch = arange(N) -> identity (already folded away)
    o_ref[...] = h[:, :IN_CHANNELS]


@jax.jit
def forward_pallas(x, a_norm, w_slab, b_slab):
    """Full GCCNLinear.forward as a single pallas_call; returns (N, IN_CHANNELS)."""
    n = x.shape[0]
    return pl.pallas_call(
        _fused_forward_kernel,
        out_shape=jax.ShapeDtypeStruct((n, IN_CHANNELS), jnp.float32),
        in_specs=[
            _vmem_spec(),                            # x        (N, IN_CHANNELS) f32
            _vmem_spec(),                            # a_norm   (N, N)           f32
            _vmem_spec(),                            # b_slab   (9, 1, PAD)      f32
            pl.BlockSpec(memory_space=pl.ANY),       # w_slab   (9, PAD, PAD)    bf16, HBM
        ],
        out_specs=_vmem_spec(),
        scratch_shapes=[
            pltpu.VMEM((N_FUSED, PAD, PAD), jnp.bfloat16),  # streamed weight buffer
            pltpu.SemaphoreType.DMA((N_FUSED,)),            # one DMA sem per layer
            pltpu.VMEM((n, PAD), jnp.float32),              # zero-padded input staging
        ],
    )(x, a_norm, b_slab, w_slab)


# ------------------------------ glue / params ------------------------------ #
def _init_layer(key, fan_in, fan_out):
    kw, kb = jax.random.split(key)
    w = jax.random.normal(kw, (fan_in, fan_out), jnp.float32) / jnp.sqrt(float(fan_in))
    b = 0.01 * jax.random.normal(kb, (fan_out,), jnp.float32)
    return w, b


def _fold_latent_decoder(layers):
    """Fold layer 4 (32->3, no act) into layer 5 (3->32, leaky) in f32 (once)."""
    (w4, b4), (w5, b5) = layers[4], layers[5]
    w45 = w4 @ w5                   # (32, 32)
    b45 = b4 @ w5 + b5              # (32,)
    return list(layers[:4]) + [(w45, b45)] + list(layers[6:])


def make_params(key):
    """Synthetic parameters mirroring the module's __init__ shapes, folded and pre-padded
    ONCE into stacked slabs so the forward path does no padding/folding work."""
    layers = []
    for (fi, fo) in LAYER_SHAPES:
        key, sub = jax.random.split(key)
        layers.append(_init_layer(sub, fi, fo))
    fused = _fold_latent_decoder(layers)
    assert len(fused) == N_FUSED
    w_slab = jnp.stack([
        jnp.zeros((PAD, PAD), jnp.float32).at[: w.shape[0], : w.shape[1]].set(w)
        for (w, _) in fused
    ]).astype(jnp.bfloat16)                      # (9, 128, 128) bf16 — MXU-native operands
    b_slab = jnp.stack([
        jnp.zeros((1, PAD), jnp.float32).at[0, : b.shape[0]].set(b)
        for (_, b) in fused
    ])                                           # (9, 1, 128) f32
    return layers, w_slab, b_slab


def build_norm_adj(edge_index, n):
    """Dense GCN-normalized adjacency: D^-1/2 (A + I) D^-1/2 (unit edge weights).
    Uses scatter-add so duplicate edges sum (PyG GCNConv parity)."""
    a = jnp.zeros((n, n), jnp.float32).at[edge_index[1], edge_index[0]].add(1.0)
    a = a + jnp.eye(n, dtype=jnp.float32)
    dinv = 1.0 / jnp.sqrt(a.sum(axis=1))
    return dinv[:, None] * a * dinv[None, :]


# ------------------------------- references -------------------------------- #
def forward_reference_fused(x, a_norm, w_slab, b_slab):
    """Pure-jnp reference matching the kernel's exact math (folded padded slabs,
    bf16 feature matmuls with f32 accumulation, f32 aggregation matmul)."""
    h = jnp.zeros((x.shape[0], PAD), jnp.float32).at[:, : x.shape[1]].set(x)
    for i in range(N_FUSED):
        t = jnp.dot(h.astype(jnp.bfloat16), w_slab[i], preferred_element_type=jnp.float32)
        if FUSED_KIND[i] == "gcn":
            t = jnp.dot(a_norm, t, preferred_element_type=jnp.float32,
                        precision=jax.lax.Precision.HIGHEST)
        y = t + b_slab[i]
        if FUSED_ACT[i] != "none":
            y = _leaky(y)
        if FUSED_ACT[i] == "leaky_tanh":
            y = jnp.tanh(y)
        h = y
    return h[:, :IN_CHANNELS]


def forward_reference_f32(x, a_norm, layers):
    """Unpadded, unfolded full-f32 reference mirroring the original module math."""
    h = x
    for i, (w, b) in enumerate(layers):
        t = h @ w
        if LAYER_KIND[i] == "gcn":
            t = a_norm @ t
        y = t + b
        if LAYER_ACT[i] != "none":
            y = _leaky(y)
        if LAYER_ACT[i] == "leaky_tanh":
            y = jnp.tanh(y)
        h = y
        # global_max_pool between fc_latent and fc_decoder is identity (batch=arange(N))
    return h


if __name__ == "__main__":
    key = jax.random.PRNGKey(0)
    key, kx, kp = jax.random.split(key, 3)

    # small ring graph: 8 nodes, 4 input channels, bidirectional edges
    src = jnp.arange(N_NODES, dtype=jnp.int32)
    dst = (src + 1) % N_NODES
    edge_index = jnp.stack(
        [jnp.concatenate([src, dst]), jnp.concatenate([dst, src])], axis=0
    )  # [2, 16]

    x = jax.random.normal(kx, (N_NODES, IN_CHANNELS), jnp.float32)
    a_norm = build_norm_adj(edge_index, N_NODES)
    layers, w_slab, b_slab = make_params(kp)

    out = jax.block_until_ready(forward_pallas(x, a_norm, w_slab, b_slab))

    ref_fused = forward_reference_fused(x, a_norm, w_slab, b_slab)
    ref_f32 = forward_reference_f32(x, a_norm, layers)

    assert out.shape == (N_NODES, IN_CHANNELS)
    assert jnp.allclose(out, ref_fused, atol=2e-2, rtol=2e-2), \
        "mismatch vs math-matched (folded, bf16-weight) reference"
    assert jnp.allclose(out, ref_f32, atol=1e-1, rtol=1e-1), \
        "mismatch vs unfolded f32 module reference"

    # TODO(synk): Dropout(p=0.2) layers are identity here (inference mode); training-mode
    # stochastic dropout is not implemented.
    print("KERNEL_OK")
</pallas_src>

<mosaic_0001>
module attributes {stable_mosaic.version = 11 : i64} {
  func.func @_fused_forward_kernel(%arg0: memref<8x4xf32, #tpu.memory_space<vmem>>, %arg1: memref<8x8xf32, #tpu.memory_space<vmem>>, %arg2: memref<9x1x128xf32, #tpu.memory_space<vmem>>, %arg3: memref<9x128x128xbf16, #tpu.memory_space<any>>, %arg4: memref<8x4xf32, #tpu.memory_space<vmem>>, %arg5: memref<9x128x128xbf16, #tpu.memory_space<vmem>>, %arg6: memref<9x!tpu.dma_semaphore, #tpu.memory_space<semaphore_mem>>, %arg7: memref<8x128xf32, #tpu.memory_space<vmem>>) attributes {dimension_semantics = [], scalar_prefetch = 0 : i64, scratch_operands = 3 : i64, tpu.core_type = #tpu.core_type<tc>} {
    %c0_i32 = arith.constant 0 : i32
    %c0_i32_0 = arith.constant 0 : i32
    %c0_i32_1 = arith.constant 0 : i32
    %c0_i32_2 = arith.constant 0 : i32
    %c0_i32_3 = arith.constant 0 : i32
    %0 = tpu.memref_slice %arg3[%c0_i32, %c0_i32_2, %c0_i32_3] : memref<9x128x128xbf16, #tpu.memory_space<any>> -> memref<1x128x128xbf16, #tpu.memory_space<any>>
    %1 = tpu.memref_squeeze %0 : memref<1x128x128xbf16, #tpu.memory_space<any>> -> memref<128x128xbf16, #tpu.memory_space<any>>
    %c0_i32_4 = arith.constant 0 : i32
    %c0_i32_5 = arith.constant 0 : i32
    %2 = tpu.memref_slice %arg5[%c0_i32_0, %c0_i32_4, %c0_i32_5] : memref<9x128x128xbf16, #tpu.memory_space<vmem>> -> memref<1x128x128xbf16, #tpu.memory_space<vmem>>
    %3 = tpu.memref_squeeze %2 : memref<1x128x128xbf16, #tpu.memory_space<vmem>> -> memref<128x128xbf16, #tpu.memory_space<vmem>>
    %4 = tpu.memref_slice %arg6[%c0_i32_1] : memref<9x!tpu.dma_semaphore, #tpu.memory_space<semaphore_mem>> -> memref<1x!tpu.dma_semaphore, #tpu.memory_space<semaphore_mem>>
    %5 = tpu.memref_squeeze %4 : memref<1x!tpu.dma_semaphore, #tpu.memory_space<semaphore_mem>> -> memref<!tpu.dma_semaphore, #tpu.memory_space<semaphore_mem>>
    tpu.enqueue_dma source(%1 : memref<128x128xbf16, #tpu.memory_space<any>>) target(%3 : memref<128x128xbf16, #tpu.memory_space<vmem>>) target_semaphore(%5 : memref<!tpu.dma_semaphore, #tpu.memory_space<semaphore_mem>>)
    %c1_i32 = arith.constant 1 : i32
    %c1_i32_6 = arith.constant 1 : i32
    %c1_i32_7 = arith.constant 1 : i32
    %c0_i32_8 = arith.constant 0 : i32
    %c0_i32_9 = arith.constant 0 : i32
    %6 = tpu.memref_slice %arg3[%c1_i32, %c0_i32_8, %c0_i32_9] : memref<9x128x128xbf16, #tpu.memory_space<any>> -> memref<1x128x128xbf16, #tpu.memory_space<any>>
    %7 = tpu.memref_squeeze %6 : memref<1x128x128xbf16, #tpu.memory_space<any>> -> memref<128x128xbf16, #tpu.memory_space<any>>
    %c0_i32_10 = arith.constant 0 : i32
    %c0_i32_11 = arith.constant 0 : i32
    %8 = tpu.memref_slice %arg5[%c1_i32_6, %c0_i32_10, %c0_i32_11] : memref<9x128x128xbf16, #tpu.memory_space<vmem>> -> memref<1x128x128xbf16, #tpu.memory_space<vmem>>
    %9 = tpu.memref_squeeze %8 : memref<1x128x128xbf16, #tpu.memory_space<vmem>> -> memref<128x128xbf16, #tpu.memory_space<vmem>>
    %10 = tpu.memref_slice %arg6[%c1_i32_7] : memref<9x!tpu.dma_semaphore, #tpu.memory_space<semaphore_mem>> -> memref<1x!tpu.dma_semaphore, #tpu.memory_space<semaphore_mem>>
    %11 = tpu.memref_squeeze %10 : memref<1x!tpu.dma_semaphore, #tpu.memory_space<semaphore_mem>> -> memref<!tpu.dma_semaphore, #tpu.memory_space<semaphore_mem>>
    tpu.enqueue_dma source(%7 : memref<128x128xbf16, #tpu.memory_space<any>>) target(%9 : memref<128x128xbf16, #tpu.memory_space<vmem>>) target_semaphore(%11 : memref<!tpu.dma_semaphore, #tpu.memory_space<semaphore_mem>>)
    %c2_i32 = arith.constant 2 : i32
    %c2_i32_12 = arith.constant 2 : i32
    %c2_i32_13 = arith.constant 2 : i32
    %c0_i32_14 = arith.constant 0 : i32
    %c0_i32_15 = arith.constant 0 : i32
    %12 = tpu.memref_slice %arg3[%c2_i32, %c0_i32_14, %c0_i32_15] : memref<9x128x128xbf16, #tpu.memory_space<any>> -> memref<1x128x128xbf16, #tpu.memory_space<any>>
    %13 = tpu.memref_squeeze %12 : memref<1x128x128xbf16, #tpu.memory_space<any>> -> memref<128x128xbf16, #tpu.memory_space<any>>
    %c0_i32_16 = arith.constant 0 : i32
    %c0_i32_17 = arith.constant 0 : i32
    %14 = tpu.memref_slice %arg5[%c2_i32_12, %c0_i32_16, %c0_i32_17] : memref<9x128x128xbf16, #tpu.memory_space<vmem>> -> memref<1x128x128xbf16, #tpu.memory_space<vmem>>
    %15 = tpu.memref_squeeze %14 : memref<1x128x128xbf16, #tpu.memory_space<vmem>> -> memref<128x128xbf16, #tpu.memory_space<vmem>>
    %16 = tpu.memref_slice %arg6[%c2_i32_13] : memref<9x!tpu.dma_semaphore, #tpu.memory_space<semaphore_mem>> -> memref<1x!tpu.dma_semaphore, #tpu.memory_space<semaphore_mem>>
    %17 = tpu.memref_squeeze %16 : memref<1x!tpu.dma_semaphore, #tpu.memory_space<semaphore_mem>> -> memref<!tpu.dma_semaphore, #tpu.memory_space<semaphore_mem>>
    tpu.enqueue_dma source(%13 : memref<128x128xbf16, #tpu.memory_space<any>>) target(%15 : memref<128x128xbf16, #tpu.memory_space<vmem>>) target_semaphore(%17 : memref<!tpu.dma_semaphore, #tpu.memory_space<semaphore_mem>>)
    %c3_i32 = arith.constant 3 : i32
    %c3_i32_18 = arith.constant 3 : i32
    %c3_i32_19 = arith.constant 3 : i32
    %c0_i32_20 = arith.constant 0 : i32
    %c0_i32_21 = arith.constant 0 : i32
    %18 = tpu.memref_slice %arg3[%c3_i32, %c0_i32_20, %c0_i32_21] : memref<9x128x128xbf16, #tpu.memory_space<any>> -> memref<1x128x128xbf16, #tpu.memory_space<any>>
    %19 = tpu.memref_squeeze %18 : memref<1x128x128xbf16, #tpu.memory_space<any>> -> memref<128x128xbf16, #tpu.memory_space<any>>
    %c0_i32_22 = arith.constant 0 : i32
    %c0_i32_23 = arith.constant 0 : i32
    %20 = tpu.memref_slice %arg5[%c3_i32_18, %c0_i32_22, %c0_i32_23] : memref<9x128x128xbf16, #tpu.memory_space<vmem>> -> memref<1x128x128xbf16, #tpu.memory_space<vmem>>
    %21 = tpu.memref_squeeze %20 : memref<1x128x128xbf16, #tpu.memory_space<vmem>> -> memref<128x128xbf16, #tpu.memory_space<vmem>>
    %22 = tpu.memref_slice %arg6[%c3_i32_19] : memref<9x!tpu.dma_semaphore, #tpu.memory_space<semaphore_mem>> -> memref<1x!tpu.dma_semaphore, #tpu.memory_space<semaphore_mem>>
    %23 = tpu.memref_squeeze %22 : memref<1x!tpu.dma_semaphore, #tpu.memory_space<semaphore_mem>> -> memref<!tpu.dma_semaphore, #tpu.memory_space<semaphore_mem>>
    tpu.enqueue_dma source(%19 : memref<128x128xbf16, #tpu.memory_space<any>>) target(%21 : memref<128x128xbf16, #tpu.memory_space<vmem>>) target_semaphore(%23 : memref<!tpu.dma_semaphore, #tpu.memory_space<semaphore_mem>>)
    %c4_i32 = arith.constant 4 : i32
    %c4_i32_24 = arith.constant 4 : i32
    %c4_i32_25 = arith.constant 4 : i32
    %c0_i32_26 = arith.constant 0 : i32
    %c0_i32_27 = arith.constant 0 : i32
    %24 = tpu.memref_slice %arg3[%c4_i32, %c0_i32_26, %c0_i32_27] : memref<9x128x128xbf16, #tpu.memory_space<any>> -> memref<1x128x128xbf16, #tpu.memory_space<any>>
    %25 = tpu.memref_squeeze %24 : memref<1x128x128xbf16, #tpu.memory_space<any>> -> memref<128x128xbf16, #tpu.memory_space<any>>
    %c0_i32_28 = arith.constant 0 : i32
    %c0_i32_29 = arith.constant 0 : i32
    %26 = tpu.memref_slice %arg5[%c4_i32_24, %c0_i32_28, %c0_i32_29] : memref<9x128x128xbf16, #tpu.memory_space<vmem>> -> memref<1x128x128xbf16, #tpu.memory_space<vmem>>
    %27 = tpu.memref_squeeze %26 : memref<1x128x128xbf16, #tpu.memory_space<vmem>> -> memref<128x128xbf16, #tpu.memory_space<vmem>>
    %28 = tpu.memref_slice %arg6[%c4_i32_25] : memref<9x!tpu.dma_semaphore, #tpu.memory_space<semaphore_mem>> -> memref<1x!tpu.dma_semaphore, #tpu.memory_space<semaphore_mem>>
    %29 = tpu.memref_squeeze %28 : memref<1x!tpu.dma_semaphore, #tpu.memory_space<semaphore_mem>> -> memref<!tpu.dma_semaphore, #tpu.memory_space<semaphore_mem>>
    tpu.enqueue_dma source(%25 : memref<128x128xbf16, #tpu.memory_space<any>>) target(%27 : memref<128x128xbf16, #tpu.memory_space<vmem>>) target_semaphore(%29 : memref<!tpu.dma_semaphore, #tpu.memory_space<semaphore_mem>>)
    %c5_i32 = arith.constant 5 : i32
    %c5_i32_30 = arith.constant 5 : i32
    %c5_i32_31 = arith.constant 5 : i32
    %c0_i32_32 = arith.constant 0 : i32
    %c0_i32_33 = arith.constant 0 : i32
    %30 = tpu.memref_slice %arg3[%c5_i32, %c0_i32_32, %c0_i32_33] : memref<9x128x128xbf16, #tpu.memory_space<any>> -> memref<1x128x128xbf16, #tpu.memory_space<any>>
    %31 = tpu.memref_squeeze %30 : memref<1x128x128xbf16, #tpu.memory_space<any>> -> memref<128x128xbf16, #tpu.memory_space<any>>
    %c0_i32_34 = arith.constant 0 : i32
    %c0_i32_35 = arith.constant 0 : i32
    %32 = tpu.memref_slice %arg5[%c5_i32_30, %c0_i32_34, %c0_i32_35] : memref<9x128x128xbf16, #tpu.memory_space<vmem>> -> memref<1x128x128xbf16, #tpu.memory_space<vmem>>
    %33 = tpu.memref_squeeze %32 : memref<1x128x128xbf16, #tpu.memory_space<vmem>> -> memref<128x128xbf16, #tpu.memory_space<vmem>>
    %34 = tpu.memref_slice %arg6[%c5_i32_31] : memref<9x!tpu.dma_semaphore, #tpu.memory_space<semaphore_mem>> -> memref<1x!tpu.dma_semaphore, #tpu.memory_space<semaphore_mem>>
    %35 = tpu.memref_squeeze %34 : memref<1x!tpu.dma_semaphore, #tpu.memory_space<semaphore_mem>> -> memref<!tpu.dma_semaphore, #tpu.memory_space<semaphore_mem>>
    tpu.enqueue_dma source(%31 : memref<128x128xbf16, #tpu.memory_space<any>>) target(%33 : memref<128x128xbf16, #tpu.memory_space<vmem>>) target_semaphore(%35 : memref<!tpu.dma_semaphore, #tpu.memory_space<semaphore_mem>>)
    %c6_i32 = arith.constant 6 : i32
    %c6_i32_36 = arith.constant 6 : i32
    %c6_i32_37 = arith.constant 6 : i32
    %c0_i32_38 = arith.constant 0 : i32
    %c0_i32_39 = arith.constant 0 : i32
    %36 = tpu.memref_slice %arg3[%c6_i32, %c0_i32_38, %c0_i32_39] : memref<9x128x128xbf16, #tpu.memory_space<any>> -> memref<1x128x128xbf16, #tpu.memory_space<any>>
    %37 = tpu.memref_squeeze %36 : memref<1x128x128xbf16, #tpu.memory_space<any>> -> memref<128x128xbf16, #tpu.memory_space<any>>
    %c0_i32_40 = arith.constant 0 : i32
    %c0_i32_41 = arith.constant 0 : i32
    %38 = tpu.memref_slice %arg5[%c6_i32_36, %c0_i32_40, %c0_i32_41] : memref<9x128x128xbf16, #tpu.memory_space<vmem>> -> memref<1x128x128xbf16, #tpu.memory_space<vmem>>
    %39 = tpu.memref_squeeze %38 : memref<1x128x128xbf16, #tpu.memory_space<vmem>> -> memref<128x128xbf16, #tpu.memory_space<vmem>>
    %40 = tpu.memref_slice %arg6[%c6_i32_37] : memref<9x!tpu.dma_semaphore, #tpu.memory_space<semaphore_mem>> -> memref<1x!tpu.dma_semaphore, #tpu.memory_space<semaphore_mem>>
    %41 = tpu.memref_squeeze %40 : memref<1x!tpu.dma_semaphore, #tpu.memory_space<semaphore_mem>> -> memref<!tpu.dma_semaphore, #tpu.memory_space<semaphore_mem>>
    tpu.enqueue_dma source(%37 : memref<128x128xbf16, #tpu.memory_space<any>>) target(%39 : memref<128x128xbf16, #tpu.memory_space<vmem>>) target_semaphore(%41 : memref<!tpu.dma_semaphore, #tpu.memory_space<semaphore_mem>>)
    %c7_i32 = arith.constant 7 : i32
    %c7_i32_42 = arith.constant 7 : i32
    %c7_i32_43 = arith.constant 7 : i32
    %c0_i32_44 = arith.constant 0 : i32
    %c0_i32_45 = arith.constant 0 : i32
    %42 = tpu.memref_slice %arg3[%c7_i32, %c0_i32_44, %c0_i32_45] : memref<9x128x128xbf16, #tpu.memory_space<any>> -> memref<1x128x128xbf16, #tpu.memory_space<any>>
    %43 = tpu.memref_squeeze %42 : memref<1x128x128xbf16, #tpu.memory_space<any>> -> memref<128x128xbf16, #tpu.memory_space<any>>
    %c0_i32_46 = arith.constant 0 : i32
    %c0_i32_47 = arith.constant 0 : i32
    %44 = tpu.memref_slice %arg5[%c7_i32_42, %c0_i32_46, %c0_i32_47] : memref<9x128x128xbf16, #tpu.memory_space<vmem>> -> memref<1x128x128xbf16, #tpu.memory_space<vmem>>
    %45 = tpu.memref_squeeze %44 : memref<1x128x128xbf16, #tpu.memory_space<vmem>> -> memref<128x128xbf16, #tpu.memory_space<vmem>>
    %46 = tpu.memref_slice %arg6[%c7_i32_43] : memref<9x!tpu.dma_semaphore, #tpu.memory_space<semaphore_mem>> -> memref<1x!tpu.dma_semaphore, #tpu.memory_space<semaphore_mem>>
    %47 = tpu.memref_squeeze %46 : memref<1x!tpu.dma_semaphore, #tpu.memory_space<semaphore_mem>> -> memref<!tpu.dma_semaphore, #tpu.memory_space<semaphore_mem>>
    tpu.enqueue_dma source(%43 : memref<128x128xbf16, #tpu.memory_space<any>>) target(%45 : memref<128x128xbf16, #tpu.memory_space<vmem>>) target_semaphore(%47 : memref<!tpu.dma_semaphore, #tpu.memory_space<semaphore_mem>>)
    %c8_i32 = arith.constant 8 : i32
    %c8_i32_48 = arith.constant 8 : i32
    %c8_i32_49 = arith.constant 8 : i32
    %c0_i32_50 = arith.constant 0 : i32
    %c0_i32_51 = arith.constant 0 : i32
    %48 = tpu.memref_slice %arg3[%c8_i32, %c0_i32_50, %c0_i32_51] : memref<9x128x128xbf16, #tpu.memory_space<any>> -> memref<1x128x128xbf16, #tpu.memory_space<any>>
    %49 = tpu.memref_squeeze %48 : memref<1x128x128xbf16, #tpu.memory_space<any>> -> memref<128x128xbf16, #tpu.memory_space<any>>
    %c0_i32_52 = arith.constant 0 : i32
    %c0_i32_53 = arith.constant 0 : i32
    %50 = tpu.memref_slice %arg5[%c8_i32_48, %c0_i32_52, %c0_i32_53] : memref<9x128x128xbf16, #tpu.memory_space<vmem>> -> memref<1x128x128xbf16, #tpu.memory_space<vmem>>
    %51 = tpu.memref_squeeze %50 : memref<1x128x128xbf16, #tpu.memory_space<vmem>> -> memref<128x128xbf16, #tpu.memory_space<vmem>>
    %52 = tpu.memref_slice %arg6[%c8_i32_49] : memref<9x!tpu.dma_semaphore, #tpu.memory_space<semaphore_mem>> -> memref<1x!tpu.dma_semaphore, #tpu.memory_space<semaphore_mem>>
    %53 = tpu.memref_squeeze %52 : memref<1x!tpu.dma_semaphore, #tpu.memory_space<semaphore_mem>> -> memref<!tpu.dma_semaphore, #tpu.memory_space<semaphore_mem>>
    tpu.enqueue_dma source(%49 : memref<128x128xbf16, #tpu.memory_space<any>>) target(%51 : memref<128x128xbf16, #tpu.memory_space<vmem>>) target_semaphore(%53 : memref<!tpu.dma_semaphore, #tpu.memory_space<semaphore_mem>>)
    %cst = arith.constant 0.000000e+00 : f32
    %54 = vector.broadcast %cst : f32 to vector<8x128xf32>
    %c0 = arith.constant 0 : index
    %c0_54 = arith.constant 0 : index
    %55 = vector.load %arg7[%c0, %c0_54] : memref<8x128xf32, #tpu.memory_space<vmem>>, vector<8x128xf32>
    tpu.vector_store %arg7[%c0, %c0_54], %54 {strides = array<i32>} : memref<8x128xf32, #tpu.memory_space<vmem>>, vector<8x128xf32>,
    %c0_55 = arith.constant 0 : index
    %c0_56 = arith.constant 0 : index
    %56 = vector.load %arg0[%c0_55, %c0_56] : memref<8x4xf32, #tpu.memory_space<vmem>>, vector<8x4xf32>
    %c0_57 = arith.constant 0 : index
    %c0_58 = arith.constant 0 : index
    %57 = vector.load %arg7[%c0_57, %c0_58] : memref<8x128xf32, #tpu.memory_space<vmem>>, vector<8x4xf32>
    tpu.vector_store %arg7[%c0_57, %c0_58], %56 {strides = array<i32>} : memref<8x128xf32, #tpu.memory_space<vmem>>, vector<8x4xf32>,
    %c0_59 = arith.constant 0 : index
    %c0_60 = arith.constant 0 : index
    %58 = vector.load %arg7[%c0_59, %c0_60] : memref<8x128xf32, #tpu.memory_space<vmem>>, vector<8x128xf32>
    %c0_61 = arith.constant 0 : index
    %c0_62 = arith.constant 0 : index
    %59 = vector.load %arg1[%c0_61, %c0_62] : memref<8x8xf32, #tpu.memory_space<vmem>>, vector<8x8xf32>
    %c0_i32_63 = arith.constant 0 : i32
    %c0_i32_64 = arith.constant 0 : i32
    %c0_i32_65 = arith.constant 0 : i32
    %c0_i32_66 = arith.constant 0 : i32
    %c0_i32_67 = arith.constant 0 : i32
    %60 = tpu.memref_slice %arg3[%c0_i32_63, %c0_i32_66, %c0_i32_67] : memref<9x128x128xbf16, #tpu.memory_space<any>> -> memref<1x128x128xbf16, #tpu.memory_space<any>>
    %61 = tpu.memref_squeeze %60 : memref<1x128x128xbf16, #tpu.memory_space<any>> -> memref<128x128xbf16, #tpu.memory_space<any>>
    %c0_i32_68 = arith.constant 0 : i32
    %c0_i32_69 = arith.constant 0 : i32
    %62 = tpu.memref_slice %arg5[%c0_i32_64, %c0_i32_68, %c0_i32_69] : memref<9x128x128xbf16, #tpu.memory_space<vmem>> -> memref<1x128x128xbf16, #tpu.memory_space<vmem>>
    %63 = tpu.memref_squeeze %62 : memref<1x128x128xbf16, #tpu.memory_space<vmem>> -> memref<128x128xbf16, #tpu.memory_space<vmem>>
    %64 = tpu.memref_slice %arg6[%c0_i32_65] : memref<9x!tpu.dma_semaphore, #tpu.memory_space<semaphore_mem>> -> memref<1x!tpu.dma_semaphore, #tpu.memory_space<semaphore_mem>>
    %65 = tpu.memref_squeeze %64 : memref<1x!tpu.dma_semaphore, #tpu.memory_space<semaphore_mem>> -> memref<!tpu.dma_semaphore, #tpu.memory_space<semaphore_mem>>
    tpu.wait_dma2 semaphore(%65 : memref<!tpu.dma_semaphore, #tpu.memory_space<semaphore_mem>>) src(%61 : memref<128x128xbf16, #tpu.memory_space<any>>) dst(%63 : memref<128x128xbf16, #tpu.memory_space<vmem>>)
    %c0_70 = arith.constant 0 : index
    %c0_71 = arith.constant 0 : index
    %c0_72 = arith.constant 0 : index
    %66 = vector.load %arg5[%c0_70, %c0_71, %c0_72] : memref<9x128x128xbf16, #tpu.memory_space<vmem>>, vector<1x128x128xbf16>
    %67 = vector.shape_cast %66 : vector<1x128x128xbf16> to vector<128x128xbf16>
    %68 = arith.truncf %58 : vector<8x128xf32> to vector<8x128xbf16>
    %cst_73 = arith.constant dense<0.000000e+00> : vector<8x128xf32>
    %69 = tpu.matmul %68, %67, %cst_73 {dimension_numbers = #tpu.dot_dimension_numbers<[1], [0], [0], [1], [0, 0, 1, 1], [], []>} : vector<8x128xbf16>, vector<128x128xbf16>, vector<8x128xf32> -> vector<8x128xf32>
    %cst_74 = arith.constant dense<0.000000e+00> : vector<8x128xf32>
    %70 = tpu.matmul %59, %69, %cst_74 {dimension_numbers = #tpu.dot_dimension_numbers<[1], [0], [0], [1], [0, 0, 1, 1], [], []>} : vector<8x8xf32>, vector<8x128xf32>, vector<8x128xf32> -> vector<8x128xf32>
    %c0_75 = arith.constant 0 : index
    %c0_76 = arith.constant 0 : index
    %c0_77 = arith.constant 0 : index
    %71 = vector.load %arg2[%c0_75, %c0_76, %c0_77] : memref<9x1x128xf32, #tpu.memory_space<vmem>>, vector<1x1x128xf32>
    %72 = vector.shape_cast %71 : vector<1x1x128xf32> to vector<1x128xf32>
    %73 = vector.broadcast %72 : vector<1x128xf32> to vector<8x128xf32>
    %74 = arith.addf %70, %73 : vector<8x128xf32>
    %cst_78 = arith.constant 0.00999999977 : f32
    %75 = vector.broadcast %cst_78 : f32 to vector<8x128xf32>
    %76 = arith.mulf %75, %74 : vector<8x128xf32>
    %77 = arith.maximumf %74, %76 : vector<8x128xf32>
    %c1_i32_79 = arith.constant 1 : i32
    %c1_i32_80 = arith.constant 1 : i32
    %c1_i32_81 = arith.constant 1 : i32
    %c0_i32_82 = arith.constant 0 : i32
    %c0_i32_83 = arith.constant 0 : i32
    %78 = tpu.memref_slice %arg3[%c1_i32_79, %c0_i32_82, %c0_i32_83] : memref<9x128x128xbf16, #tpu.memory_space<any>> -> memref<1x128x128xbf16, #tpu.memory_space<any>>
    %79 = tpu.memref_squeeze %78 : memref<1x128x128xbf16, #tpu.memory_space<any>> -> memref<128x128xbf16, #tpu.memory_space<any>>
    %c0_i32_84 = arith.constant 0 : i32
    %c0_i32_85 = arith.constant 0 : i32
    %80 = tpu.memref_slice %arg5[%c1_i32_80, %c0_i32_84, %c0_i32_85] : memref<9x128x128xbf16, #tpu.memory_space<vmem>> -> memref<1x128x128xbf16, #tpu.memory_space<vmem>>
    %81 = tpu.memref_squeeze %80 : memref<1x128x128xbf16, #tpu.memory_space<vmem>> -> memref<128x128xbf16, #tpu.memory_space<vmem>>
    %82 = tpu.memref_slice %arg6[%c1_i32_81] : memref<9x!tpu.dma_semaphore, #tpu.memory_space<semaphore_mem>> -> memref<1x!tpu.dma_semaphore, #tpu.memory_space<semaphore_mem>>
    %83 = tpu.memref_squeeze %82 : memref<1x!tpu.dma_semaphore, #tpu.memory_space<semaphore_mem>> -> memref<!tpu.dma_semaphore, #tpu.memory_space<semaphore_mem>>
    tpu.wait_dma2 semaphore(%83 : memref<!tpu.dma_semaphore, #tpu.memory_space<semaphore_mem>>) src(%79 : memref<128x128xbf16, #tpu.memory_space<any>>) dst(%81 : memref<128x128xbf16, #tpu.memory_space<vmem>>)
    %c1 = arith.constant 1 : index
    %c0_86 = arith.constant 0 : index
    %c0_87 = arith.constant 0 : index
    %84 = vector.load %arg5[%c1, %c0_86, %c0_87] : memref<9x128x128xbf16, #tpu.memory_space<vmem>>, vector<1x128x128xbf16>
    %85 = vector.shape_cast %84 : vector<1x128x128xbf16> to vector<128x128xbf16>
    %86 = arith.truncf %77 : vector<8x128xf32> to vector<8x128xbf16>
    %cst_88 = arith.constant dense<0.000000e+00> : vector<8x128xf32>
    %87 = tpu.matmul %86, %85, %cst_88 {dimension_numbers = #tpu.dot_dimension_numbers<[1], [0], [0], [1], [0, 0, 1, 1], [], []>} : vector<8x128xbf16>, vector<128x128xbf16>, vector<8x128xf32> -> vector<8x128xf32>
    %cst_89 = arith.constant dense<0.000000e+00> : vector<8x128xf32>
    %88 = tpu.matmul %59, %87, %cst_89 {dimension_numbers = #tpu.dot_dimension_numbers<[1], [0], [0], [1], [0, 0, 1, 1], [], []>} : vector<8x8xf32>, vector<8x128xf32>, vector<8x128xf32> -> vector<8x128xf32>
    %c1_90 = arith.constant 1 : index
    %c0_91 = arith.constant 0 : index
    %c0_92 = arith.constant 0 : index
    %89 = vector.load %arg2[%c1_90, %c0_91, %c0_92] : memref<9x1x128xf32, #tpu.memory_space<vmem>>, vector<1x1x128xf32>
    %90 = vector.shape_cast %89 : vector<1x1x128xf32> to vector<1x128xf32>
    %91 = vector.broadcast %90 : vector<1x128xf32> to vector<8x128xf32>
    %92 = arith.addf %88, %91 : vector<8x128xf32>
    %cst_93 = arith.constant 0.00999999977 : f32
    %93 = vector.broadcast %cst_93 : f32 to vector<8x128xf32>
    %94 = arith.mulf %93, %92 : vector<8x128xf32>
    %95 = arith.maximumf %92, %94 : vector<8x128xf32>
    %c2_i32_94 = arith.constant 2 : i32
    %c2_i32_95 = arith.constant 2 : i32
    %c2_i32_96 = arith.constant 2 : i32
    %c0_i32_97 = arith.constant 0 : i32
    %c0_i32_98 = arith.constant 0 : i32
    %96 = tpu.memref_slice %arg3[%c2_i32_94, %c0_i32_97, %c0_i32_98] : memref<9x128x128xbf16, #tpu.memory_space<any>> -> memref<1x128x128xbf16, #tpu.memory_space<any>>
    %97 = tpu.memref_squeeze %96 : memref<1x128x128xbf16, #tpu.memory_space<any>> -> memref<128x128xbf16, #tpu.memory_space<any>>
    %c0_i32_99 = arith.constant 0 : i32
    %c0_i32_100 = arith.constant 0 : i32
    %98 = tpu.memref_slice %arg5[%c2_i32_95, %c0_i32_99, %c0_i32_100] : memref<9x128x128xbf16, #tpu.memory_space<vmem>> -> memref<1x128x128xbf16, #tpu.memory_space<vmem>>
    %99 = tpu.memref_squeeze %98 : memref<1x128x128xbf16, #tpu.memory_space<vmem>> -> memref<128x128xbf16, #tpu.memory_space<vmem>>
    %100 = tpu.memref_slice %arg6[%c2_i32_96] : memref<9x!tpu.dma_semaphore, #tpu.memory_space<semaphore_mem>> -> memref<1x!tpu.dma_semaphore, #tpu.memory_space<semaphore_mem>>
    %101 = tpu.memref_squeeze %100 : memref<1x!tpu.dma_semaphore, #tpu.memory_space<semaphore_mem>> -> memref<!tpu.dma_semaphore, #tpu.memory_space<semaphore_mem>>
    tpu.wait_dma2 semaphore(%101 : memref<!tpu.dma_semaphore, #tpu.memory_space<semaphore_mem>>) src(%97 : memref<128x128xbf16, #tpu.memory_space<any>>) dst(%99 : memref<128x128xbf16, #tpu.memory_space<vmem>>)
    %c2 = arith.constant 2 : index
    %c0_101 = arith.constant 0 : index
    %c0_102 = arith.constant 0 : index
    %102 = vector.load %arg5[%c2, %c0_101, %c0_102] : memref<9x128x128xbf16, #tpu.memory_space<vmem>>, vector<1x128x128xbf16>
    %103 = vector.shape_cast %102 : vector<1x128x128xbf16> to vector<128x128xbf16>
    %104 = arith.truncf %95 : vector<8x128xf32> to vector<8x128xbf16>
    %cst_103 = arith.constant dense<0.000000e+00> : vector<8x128xf32>
    %105 = tpu.matmul %104, %103, %cst_103 {dimension_numbers = #tpu.dot_dimension_numbers<[1], [0], [0], [1], [0, 0, 1, 1], [], []>} : vector<8x128xbf16>, vector<128x128xbf16>, vector<8x128xf32> -> vector<8x128xf32>
    %cst_104 = arith.constant dense<0.000000e+00> : vector<8x128xf32>
    %106 = tpu.matmul %59, %105, %cst_104 {dimension_numbers = #tpu.dot_dimension_numbers<[1], [0], [0], [1], [0, 0, 1, 1], [], []>} : vector<8x8xf32>, vector<8x128xf32>, vector<8x128xf32> -> vector<8x128xf32>
    %c2_105 = arith.constant 2 : index
    %c0_106 = arith.constant 0 : index
    %c0_107 = arith.constant 0 : index
    %107 = vector.load %arg2[%c2_105, %c0_106, %c0_107] : memref<9x1x128xf32, #tpu.memory_space<vmem>>, vector<1x1x128xf32>
    %108 = vector.shape_cast %107 : vector<1x1x128xf32> to vector<1x128xf32>
    %109 = vector.broadcast %108 : vector<1x128xf32> to vector<8x128xf32>
    %110 = arith.addf %106, %109 : vector<8x128xf32>
    %cst_108 = arith.constant 0.00999999977 : f32
    %111 = vector.broadcast %cst_108 : f32 to vector<8x128xf32>
    %112 = arith.mulf %111, %110 : vector<8x128xf32>
    %113 = arith.maximumf %110, %112 : vector<8x128xf32>
    %c3_i32_109 = arith.constant 3 : i32
    %c3_i32_110 = arith.constant 3 : i32
    %c3_i32_111 = arith.constant 3 : i32
    %c0_i32_112 = arith.constant 0 : i32
    %c0_i32_113 = arith.constant 0 : i32
    %114 = tpu.memref_slice %arg3[%c3_i32_109, %c0_i32_112, %c0_i32_113] : memref<9x128x128xbf16, #tpu.memory_space<any>> -> memref<1x128x128xbf16, #tpu.memory_space<any>>
    %115 = tpu.memref_squeeze %114 : memref<1x128x128xbf16, #tpu.memory_space<any>> -> memref<128x128xbf16, #tpu.memory_space<any>>
    %c0_i32_114 = arith.constant 0 : i32
    %c0_i32_115 = arith.constant 0 : i32
    %116 = tpu.memref_slice %arg5[%c3_i32_110, %c0_i32_114, %c0_i32_115] : memref<9x128x128xbf16, #tpu.memory_space<vmem>> -> memref<1x128x128xbf16, #tpu.memory_space<vmem>>
    %117 = tpu.memref_squeeze %116 : memref<1x128x128xbf16, #tpu.memory_space<vmem>> -> memref<128x128xbf16, #tpu.memory_space<vmem>>
    %118 = tpu.memref_slice %arg6[%c3_i32_111] : memref<9x!tpu.dma_semaphore, #tpu.memory_space<semaphore_mem>> -> memref<1x!tpu.dma_semaphore, #tpu.memory_space<semaphore_mem>>
    %119 = tpu.memref_squeeze %118 : memref<1x!tpu.dma_semaphore, #tpu.memory_space<semaphore_mem>> -> memref<!tpu.dma_semaphore, #tpu.memory_space<semaphore_mem>>
    tpu.wait_dma2 semaphore(%119 : memref<!tpu.dma_semaphore, #tpu.memory_space<semaphore_mem>>) src(%115 : memref<128x128xbf16, #tpu.memory_space<any>>) dst(%117 : memref<128x128xbf16, #tpu.memory_space<vmem>>)
    %c3 = arith.constant 3 : index
    %c0_116 = arith.constant 0 : index
    %c0_117 = arith.constant 0 : index
    %120 = vector.load %arg5[%c3, %c0_116, %c0_117] : memref<9x128x128xbf16, #tpu.memory_space<vmem>>, vector<1x128x128xbf16>
    %121 = vector.shape_cast %120 : vector<1x128x128xbf16> to vector<128x128xbf16>
    %122 = arith.truncf %113 : vector<8x128xf32> to vector<8x128xbf16>
    %cst_118 = arith.constant dense<0.000000e+00> : vector<8x128xf32>
    %123 = tpu.matmul %122, %121, %cst_118 {dimension_numbers = #tpu.dot_dimension_numbers<[1], [0], [0], [1], [0, 0, 1, 1], [], []>} : vector<8x128xbf16>, vector<128x128xbf16>, vector<8x128xf32> -> vector<8x128xf32>
    %c3_119 = arith.constant 3 : index
    %c0_120 = arith.constant 0 : index
    %c0_121 = arith.constant 0 : index
    %124 = vector.load %arg2[%c3_119, %c0_120, %c0_121] : memref<9x1x128xf32, #tpu.memory_space<vmem>>, vector<1x1x128xf32>
    %125 = vector.shape_cast %124 : vector<1x1x128xf32> to vector<1x128xf32>
    %126 = vector.broadcast %125 : vector<1x128xf32> to vector<8x128xf32>
    %127 = arith.addf %123, %126 : vector<8x128xf32>
    %cst_122 = arith.constant 0.00999999977 : f32
    %128 = vector.broadcast %cst_122 : f32 to vector<8x128xf32>
    %129 = arith.mulf %128, %127 : vector<8x128xf32>
    %130 = arith.maximumf %127, %129 : vector<8x128xf32>
    %c4_i32_123 = arith.constant 4 : i32
    %c4_i32_124 = arith.constant 4 : i32
    %c4_i32_125 = arith.constant 4 : i32
    %c0_i32_126 = arith.constant 0 : i32
    %c0_i32_127 = arith.constant 0 : i32
    %131 = tpu.memref_slice %arg3[%c4_i32_123, %c0_i32_126, %c0_i32_127] : memref<9x128x128xbf16, #tpu.memory_space<any>> -> memref<1x128x128xbf16, #tpu.memory_space<any>>
    %132 = tpu.memref_squeeze %131 : memref<1x128x128xbf16, #tpu.memory_space<any>> -> memref<128x128xbf16, #tpu.memory_space<any>>
    %c0_i32_128 = arith.constant 0 : i32
    %c0_i32_129 = arith.constant 0 : i32
    %133 = tpu.memref_slice %arg5[%c4_i32_124, %c0_i32_128, %c0_i32_129] : memref<9x128x128xbf16, #tpu.memory_space<vmem>> -> memref<1x128x128xbf16, #tpu.memory_space<vmem>>
    %134 = tpu.memref_squeeze %133 : memref<1x128x128xbf16, #tpu.memory_space<vmem>> -> memref<128x128xbf16, #tpu.memory_space<vmem>>
    %135 = tpu.memref_slice %arg6[%c4_i32_125] : memref<9x!tpu.dma_semaphore, #tpu.memory_space<semaphore_mem>> -> memref<1x!tpu.dma_semaphore, #tpu.memory_space<semaphore_mem>>
    %136 = tpu.memref_squeeze %135 : memref<1x!tpu.dma_semaphore, #tpu.memory_space<semaphore_mem>> -> memref<!tpu.dma_semaphore, #tpu.memory_space<semaphore_mem>>
    tpu.wait_dma2 semaphore(%136 : memref<!tpu.dma_semaphore, #tpu.memory_space<semaphore_mem>>) src(%132 : memref<128x128xbf16, #tpu.memory_space<any>>) dst(%134 : memref<128x128xbf16, #tpu.memory_space<vmem>>)
    %c4 = arith.constant 4 : index
    %c0_130 = arith.constant 0 : index
    %c0_131 = arith.constant 0 : index
    %137 = vector.load %arg5[%c4, %c0_130, %c0_131] : memref<9x128x128xbf16, #tpu.memory_space<vmem>>, vector<1x128x128xbf16>
    %138 = vector.shape_cast %137 : vector<1x128x128xbf16> to vector<128x128xbf16>
    %139 = arith.truncf %130 : vector<8x128xf32> to vector<8x128xbf16>
    %cst_132 = arith.constant dense<0.000000e+00> : vector<8x128xf32>
    %140 = tpu.matmul %139, %138, %cst_132 {dimension_numbers = #tpu.dot_dimension_numbers<[1], [0], [0], [1], [0, 0, 1, 1], [], []>} : vector<8x128xbf16>, vector<128x128xbf16>, vector<8x128xf32> -> vector<8x128xf32>
    %c4_133 = arith.constant 4 : index
    %c0_134 = arith.constant 0 : index
    %c0_135 = arith.constant 0 : index
    %141 = vector.load %arg2[%c4_133, %c0_134, %c0_135] : memref<9x1x128xf32, #tpu.memory_space<vmem>>, vector<1x1x128xf32>
    %142 = vector.shape_cast %141 : vector<1x1x128xf32> to vector<1x128xf32>
    %143 = vector.broadcast %142 : vector<1x128xf32> to vector<8x128xf32>
    %144 = arith.addf %140, %143 : vector<8x128xf32>
    %cst_136 = arith.constant 0.00999999977 : f32
    %145 = vector.broadcast %cst_136 : f32 to vector<8x128xf32>
    %146 = arith.mulf %145, %144 : vector<8x128xf32>
    %147 = arith.maximumf %144, %146 : vector<8x128xf32>
    %c5_i32_137 = arith.constant 5 : i32
    %c5_i32_138 = arith.constant 5 : i32
    %c5_i32_139 = arith.constant 5 : i32
    %c0_i32_140 = arith.constant 0 : i32
    %c0_i32_141 = arith.constant 0 : i32
    %148 = tpu.memref_slice %arg3[%c5_i32_137, %c0_i32_140, %c0_i32_141] : memref<9x128x128xbf16, #tpu.memory_space<any>> -> memref<1x128x128xbf16, #tpu.memory_space<any>>
    %149 = tpu.memref_squeeze %148 : memref<1x128x128xbf16, #tpu.memory_space<any>> -> memref<128x128xbf16, #tpu.memory_space<any>>
    %c0_i32_142 = arith.constant 0 : i32
    %c0_i32_143 = arith.constant 0 : i32
    %150 = tpu.memref_slice %arg5[%c5_i32_138, %c0_i32_142, %c0_i32_143] : memref<9x128x128xbf16, #tpu.memory_space<vmem>> -> memref<1x128x128xbf16, #tpu.memory_space<vmem>>
    %151 = tpu.memref_squeeze %150 : memref<1x128x128xbf16, #tpu.memory_space<vmem>> -> memref<128x128xbf16, #tpu.memory_space<vmem>>
    %152 = tpu.memref_slice %arg6[%c5_i32_139] : memref<9x!tpu.dma_semaphore, #tpu.memory_space<semaphore_mem>> -> memref<1x!tpu.dma_semaphore, #tpu.memory_space<semaphore_mem>>
    %153 = tpu.memref_squeeze %152 : memref<1x!tpu.dma_semaphore, #tpu.memory_space<semaphore_mem>> -> memref<!tpu.dma_semaphore, #tpu.memory_space<semaphore_mem>>
    tpu.wait_dma2 semaphore(%153 : memref<!tpu.dma_semaphore, #tpu.memory_space<semaphore_mem>>) src(%149 : memref<128x128xbf16, #tpu.memory_space<any>>) dst(%151 : memref<128x128xbf16, #tpu.memory_space<vmem>>)
    %c5 = arith.constant 5 : index
    %c0_144 = arith.constant 0 : index
    %c0_145 = arith.constant 0 : index
    %154 = vector.load %arg5[%c5, %c0_144, %c0_145] : memref<9x128x128xbf16, #tpu.memory_space<vmem>>, vector<1x128x128xbf16>
    %155 = vector.shape_cast %154 : vector<1x128x128xbf16> to vector<128x128xbf16>
    %156 = arith.truncf %147 : vector<8x128xf32> to vector<8x128xbf16>
    %cst_146 = arith.constant dense<0.000000e+00> : vector<8x128xf32>
    %157 = tpu.matmul %156, %155, %cst_146 {dimension_numbers = #tpu.dot_dimension_numbers<[1], [0], [0], [1], [0, 0, 1, 1], [], []>} : vector<8x128xbf16>, vector<128x128xbf16>, vector<8x128xf32> -> vector<8x128xf32>
    %c5_147 = arith.constant 5 : index
    %c0_148 = arith.constant 0 : index
    %c0_149 = arith.constant 0 : index
    %158 = vector.load %arg2[%c5_147, %c0_148, %c0_149] : memref<9x1x128xf32, #tpu.memory_space<vmem>>, vector<1x1x128xf32>
    %159 = vector.shape_cast %158 : vector<1x1x128xf32> to vector<1x128xf32>
    %160 = vector.broadcast %159 : vector<1x128xf32> to vector<8x128xf32>
    %161 = arith.addf %157, %160 : vector<8x128xf32>
    %cst_150 = arith.constant 0.00999999977 : f32
    %162 = vector.broadcast %cst_150 : f32 to vector<8x128xf32>
    %163 = arith.mulf %162, %161 : vector<8x128xf32>
    %164 = arith.maximumf %161, %163 : vector<8x128xf32>
    %c6_i32_151 = arith.constant 6 : i32
    %c6_i32_152 = arith.constant 6 : i32
    %c6_i32_153 = arith.constant 6 : i32
    %c0_i32_154 = arith.constant 0 : i32
    %c0_i32_155 = arith.constant 0 : i32
    %165 = tpu.memref_slice %arg3[%c6_i32_151, %c0_i32_154, %c0_i32_155] : memref<9x128x128xbf16, #tpu.memory_space<any>> -> memref<1x128x128xbf16, #tpu.memory_space<any>>
    %166 = tpu.memref_squeeze %165 : memref<1x128x128xbf16, #tpu.memory_space<any>> -> memref<128x128xbf16, #tpu.memory_space<any>>
    %c0_i32_156 = arith.constant 0 : i32
    %c0_i32_157 = arith.constant 0 : i32
    %167 = tpu.memref_slice %arg5[%c6_i32_152, %c0_i32_156, %c0_i32_157] : memref<9x128x128xbf16, #tpu.memory_space<vmem>> -> memref<1x128x128xbf16, #tpu.memory_space<vmem>>
    %168 = tpu.memref_squeeze %167 : memref<1x128x128xbf16, #tpu.memory_space<vmem>> -> memref<128x128xbf16, #tpu.memory_space<vmem>>
    %169 = tpu.memref_slice %arg6[%c6_i32_153] : memref<9x!tpu.dma_semaphore, #tpu.memory_space<semaphore_mem>> -> memref<1x!tpu.dma_semaphore, #tpu.memory_space<semaphore_mem>>
    %170 = tpu.memref_squeeze %169 : memref<1x!tpu.dma_semaphore, #tpu.memory_space<semaphore_mem>> -> memref<!tpu.dma_semaphore, #tpu.memory_space<semaphore_mem>>
    tpu.wait_dma2 semaphore(%170 : memref<!tpu.dma_semaphore, #tpu.memory_space<semaphore_mem>>) src(%166 : memref<128x128xbf16, #tpu.memory_space<any>>) dst(%168 : memref<128x128xbf16, #tpu.memory_space<vmem>>)
    %c6 = arith.constant 6 : index
    %c0_158 = arith.constant 0 : index
    %c0_159 = arith.constant 0 : index
    %171 = vector.load %arg5[%c6, %c0_158, %c0_159] : memref<9x128x128xbf16, #tpu.memory_space<vmem>>, vector<1x128x128xbf16>
    %172 = vector.shape_cast %171 : vector<1x128x128xbf16> to vector<128x128xbf16>
    %173 = arith.truncf %164 : vector<8x128xf32> to vector<8x128xbf16>
    %cst_160 = arith.constant dense<0.000000e+00> : vector<8x128xf32>
    %174 = tpu.matmul %173, %172, %cst_160 {dimension_numbers = #tpu.dot_dimension_numbers<[1], [0], [0], [1], [0, 0, 1, 1], [], []>} : vector<8x128xbf16>, vector<128x128xbf16>, vector<8x128xf32> -> vector<8x128xf32>
    %cst_161 = arith.constant dense<0.000000e+00> : vector<8x128xf32>
    %175 = tpu.matmul %59, %174, %cst_161 {dimension_numbers = #tpu.dot_dimension_numbers<[1], [0], [0], [1], [0, 0, 1, 1], [], []>} : vector<8x8xf32>, vector<8x128xf32>, vector<8x128xf32> -> vector<8x128xf32>
    %c6_162 = arith.constant 6 : index
    %c0_163 = arith.constant 0 : index
    %c0_164 = arith.constant 0 : index
    %176 = vector.load %arg2[%c6_162, %c0_163, %c0_164] : memref<9x1x128xf32, #tpu.memory_space<vmem>>, vector<1x1x128xf32>
    %177 = vector.shape_cast %176 : vector<1x1x128xf32> to vector<1x128xf32>
    %178 = vector.broadcast %177 : vector<1x128xf32> to vector<8x128xf32>
    %179 = arith.addf %175, %178 : vector<8x128xf32>
    %cst_165 = arith.constant 0.00999999977 : f32
    %180 = vector.broadcast %cst_165 : f32 to vector<8x128xf32>
    %181 = arith.mulf %180, %179 : vector<8x128xf32>
    %182 = arith.maximumf %179, %181 : vector<8x128xf32>
    %c7_i32_166 = arith.constant 7 : i32
    %c7_i32_167 = arith.constant 7 : i32
    %c7_i32_168 = arith.constant 7 : i32
    %c0_i32_169 = arith.constant 0 : i32
    %c0_i32_170 = arith.constant 0 : i32
    %183 = tpu.memref_slice %arg3[%c7_i32_166, %c0_i32_169, %c0_i32_170] : memref<9x128x128xbf16, #tpu.memory_space<any>> -> memref<1x128x128xbf16, #tpu.memory_space<any>>
    %184 = tpu.memref_squeeze %183 : memref<1x128x128xbf16, #tpu.memory_space<any>> -> memref<128x128xbf16, #tpu.memory_space<any>>
    %c0_i32_171 = arith.constant 0 : i32
    %c0_i32_172 = arith.constant 0 : i32
    %185 = tpu.memref_slice %arg5[%c7_i32_167, %c0_i32_171, %c0_i32_172] : memref<9x128x128xbf16, #tpu.memory_space<vmem>> -> memref<1x128x128xbf16, #tpu.memory_space<vmem>>
    %186 = tpu.memref_squeeze %185 : memref<1x128x128xbf16, #tpu.memory_space<vmem>> -> memref<128x128xbf16, #tpu.memory_space<vmem>>
    %187 = tpu.memref_slice %arg6[%c7_i32_168] : memref<9x!tpu.dma_semaphore, #tpu.memory_space<semaphore_mem>> -> memref<1x!tpu.dma_semaphore, #tpu.memory_space<semaphore_mem>>
    %188 = tpu.memref_squeeze %187 : memref<1x!tpu.dma_semaphore, #tpu.memory_space<semaphore_mem>> -> memref<!tpu.dma_semaphore, #tpu.memory_space<semaphore_mem>>
    tpu.wait_dma2 semaphore(%188 : memref<!tpu.dma_semaphore, #tpu.memory_space<semaphore_mem>>) src(%184 : memref<128x128xbf16, #tpu.memory_space<any>>) dst(%186 : memref<128x128xbf16, #tpu.memory_space<vmem>>)
    %c7 = arith.constant 7 : index
    %c0_173 = arith.constant 0 : index
    %c0_174 = arith.constant 0 : index
    %189 = vector.load %arg5[%c7, %c0_173, %c0_174] : memref<9x128x128xbf16, #tpu.memory_space<vmem>>, vector<1x128x128xbf16>
    %190 = vector.shape_cast %189 : vector<1x128x128xbf16> to vector<128x128xbf16>
    %191 = arith.truncf %182 : vector<8x128xf32> to vector<8x128xbf16>
    %cst_175 = arith.constant dense<0.000000e+00> : vector<8x128xf32>
    %192 = tpu.matmul %191, %190, %cst_175 {dimension_numbers = #tpu.dot_dimension_numbers<[1], [0], [0], [1], [0, 0, 1, 1], [], []>} : vector<8x128xbf16>, vector<128x128xbf16>, vector<8x128xf32> -> vector<8x128xf32>
    %cst_176 = arith.constant dense<0.000000e+00> : vector<8x128xf32>
    %193 = tpu.matmul %59, %192, %cst_176 {dimension_numbers = #tpu.dot_dimension_numbers<[1], [0], [0], [1], [0, 0, 1, 1], [], []>} : vector<8x8xf32>, vector<8x128xf32>, vector<8x128xf32> -> vector<8x128xf32>
    %c7_177 = arith.constant 7 : index
    %c0_178 = arith.constant 0 : index
    %c0_179 = arith.constant 0 : index
    %194 = vector.load %arg2[%c7_177, %c0_178, %c0_179] : memref<9x1x128xf32, #tpu.memory_space<vmem>>, vector<1x1x128xf32>
    %195 = vector.shape_cast %194 : vector<1x1x128xf32> to vector<1x128xf32>
    %196 = vector.broadcast %195 : vector<1x128xf32> to vector<8x128xf32>
    %197 = arith.addf %193, %196 : vector<8x128xf32>
    %cst_180 = arith.constant 0.00999999977 : f32
    %198 = vector.broadcast %cst_180 : f32 to vector<8x128xf32>
    %199 = arith.mulf %198, %197 : vector<8x128xf32>
    %200 = arith.maximumf %197, %199 : vector<8x128xf32>
    %c8_i32_181 = arith.constant 8 : i32
    %c8_i32_182 = arith.constant 8 : i32
    %c8_i32_183 = arith.constant 8 : i32
    %c0_i32_184 = arith.constant 0 : i32
    %c0_i32_185 = arith.constant 0 : i32
    %201 = tpu.memref_slice %arg3[%c8_i32_181, %c0_i32_184, %c0_i32_185] : memref<9x128x128xbf16, #tpu.memory_space<any>> -> memref<1x128x128xbf16, #tpu.memory_space<any>>
    %202 = tpu.memref_squeeze %201 : memref<1x128x128xbf16, #tpu.memory_space<any>> -> memref<128x128xbf16, #tpu.memory_space<any>>
    %c0_i32_186 = arith.constant 0 : i32
    %c0_i32_187 = arith.constant 0 : i32
    %203 = tpu.memref_slice %arg5[%c8_i32_182, %c0_i32_186, %c0_i32_187] : memref<9x128x128xbf16, #tpu.memory_space<vmem>> -> memref<1x128x128xbf16, #tpu.memory_space<vmem>>
    %204 = tpu.memref_squeeze %203 : memref<1x128x128xbf16, #tpu.memory_space<vmem>> -> memref<128x128xbf16, #tpu.memory_space<vmem>>
    %205 = tpu.memref_slice %arg6[%c8_i32_183] : memref<9x!tpu.dma_semaphore, #tpu.memory_space<semaphore_mem>> -> memref<1x!tpu.dma_semaphore, #tpu.memory_space<semaphore_mem>>
    %206 = tpu.memref_squeeze %205 : memref<1x!tpu.dma_semaphore, #tpu.memory_space<semaphore_mem>> -> memref<!tpu.dma_semaphore, #tpu.memory_space<semaphore_mem>>
    tpu.wait_dma2 semaphore(%206 : memref<!tpu.dma_semaphore, #tpu.memory_space<semaphore_mem>>) src(%202 : memref<128x128xbf16, #tpu.memory_space<any>>) dst(%204 : memref<128x128xbf16, #tpu.memory_space<vmem>>)
    %c8 = arith.constant 8 : index
    %c0_188 = arith.constant 0 : index
    %c0_189 = arith.constant 0 : index
    %207 = vector.load %arg5[%c8, %c0_188, %c0_189] : memref<9x128x128xbf16, #tpu.memory_space<vmem>>, vector<1x128x128xbf16>
    %208 = vector.shape_cast %207 : vector<1x128x128xbf16> to vector<128x128xbf16>
    %209 = arith.truncf %200 : vector<8x128xf32> to vector<8x128xbf16>
    %cst_190 = arith.constant dense<0.000000e+00> : vector<8x128xf32>
    %210 = tpu.matmul %209, %208, %cst_190 {dimension_numbers = #tpu.dot_dimension_numbers<[1], [0], [0], [1], [0, 0, 1, 1], [], []>} : vector<8x128xbf16>, vector<128x128xbf16>, vector<8x128xf32> -> vector<8x128xf32>
    %cst_191 = arith.constant dense<0.000000e+00> : vector<8x128xf32>
    %211 = tpu.matmul %59, %210, %cst_191 {dimension_numbers = #tpu.dot_dimension_numbers<[1], [0], [0], [1], [0, 0, 1, 1], [], []>} : vector<8x8xf32>, vector<8x128xf32>, vector<8x128xf32> -> vector<8x128xf32>
    %c8_192 = arith.constant 8 : index
    %c0_193 = arith.constant 0 : index
    %c0_194 = arith.constant 0 : index
    %212 = vector.load %arg2[%c8_192, %c0_193, %c0_194] : memref<9x1x128xf32, #tpu.memory_space<vmem>>, vector<1x1x128xf32>
    %213 = vector.shape_cast %212 : vector<1x1x128xf32> to vector<1x128xf32>
    %214 = vector.broadcast %213 : vector<1x128xf32> to vector<8x128xf32>
    %215 = arith.addf %211, %214 : vector<8x128xf32>
    %cst_195 = arith.constant 0.00999999977 : f32
    %216 = vector.broadcast %cst_195 : f32 to vector<8x128xf32>
    %217 = arith.mulf %216, %215 : vector<8x128xf32>
    %218 = arith.maximumf %215, %217 : vector<8x128xf32>
    %219 = math.tanh %218 : vector<8x128xf32>
    %220 = vector.extract_strided_slice %219 {offsets = [0, 0], sizes = [8, 4], strides = [1, 1]} : vector<8x128xf32> to vector<8x4xf32>
    %c0_196 = arith.constant 0 : index
    %c0_197 = arith.constant 0 : index
    %221 = vector.load %arg4[%c0_196, %c0_197] : memref<8x4xf32, #tpu.memory_space<vmem>>, vector<8x4xf32>
    tpu.vector_store %arg4[%c0_196, %c0_197], %220 {strides = array<i32>} : memref<8x4xf32, #tpu.memory_space<vmem>>, vector<8x4xf32>,
    return
  }
}

</mosaic_0001>

<bundles_post_ra>
// kernel: forward_pallas.1
= control target key start
LH: loop header
LB: loop body
LE: loop exit
PB: predicated region body
PF: predicated region fallthrough
CT: control target
= control target key end

     0   :  { %vm141_vm0 = vcmask 31744   ;;  %s1775_s15 = smov [#allocation2]   ;;  %v1776_v0 = vmov 0.0   ;;  %s1777_s24 = smov [#allocation2 + $0x40]   ;;  %s2159_s1 = inlined_call_operand.vmem [shape: f32[8,8], index: 1, kind: input, shape index: {}]   ;;  %s2160_s2 = inlined_call_operand.vmem [shape: f32[9,1,128], index: 2, kind: input, shape index: {}]   ;;  %s2161_s3 = inlined_call_operand.hbm [shape: bf16[9,128,128], index: 3, kind: input, shape index: {}]   ;;  %s2162_s4 = inlined_call_operand.vmem [shape: f32[8,4], index: 4, kind: output, shape index: {}]   ;;  %s2163_s0 = inlined_call_operand.vmem [shape: f32[8,4], index: 0, kind: input, shape index: {}]  }
   0x1   :  { %s23_s16 = sshll.u32 %s1775_s15, 4  ;;  %139 = vst [vmem:[#allocation4] sm:$0xff] %v1776_v0  ;;  %s1815_s19 = scalar_lea.hbm %s2161_s3, 1024  ;;  %v140_v1 = vld [vmem:[%s2163_s0] sm:$0xff]  ;;  %s1825_s16 = int_to_ptr.vmem [resolvable:$true] %s23_s16 }
   0x2   :  { %v1823_v2 = vld [vmem:[%s2159_s1] sm:$0xff]  ;;  %s37_s25 = sshll.u32 %s1777_s24, 4  ;;  %142 = vst.msk [vmem:[#allocation4] sm:$0xff] %vm141_vm0, %v140_v1  ;;  %p1536_p0 = scmp.ne.s32.totalorder %s2161_s3, %s1815_s19  ;;  %s38_s25 = int_to_ptr.vmem [resolvable:$true] %s37_s25 }
   0x3   :  { %s1835_s30 = scalar_lea.hbm %s2161_s3, 9216  ;;  %p1539_p2 = scmp.lt.u32.totalorder %s1815_s19, %s2161_s3 }
   0x4   :  { %p1538_p1 = scmp.lt.u32.totalorder %s1835_s30, %s1815_s19 }
   0x6   :  { %p1540_p3 = por %p1539_p2, %p1538_p1 }
   0x8   :  { %p1541_p4 = pnand %p1540_p3, %p1536_p0 }
   0xa   :  { %1544 = shalt.err (!%p1541_p4)  }
   0xb   :  { %s1545_s7 = scalar_lea.vmem %s1825_s16, 1024  ;;  %s1851_s8 = scalar_lea.vmem %s1825_s16, 9216 }
   0xc   :  { %p1546_p5 = scmp.ne.s32.totalorder %s1825_s16, %s1545_s7  ;;  %p1550_p6 = scmp.lt.s32.totalorder %s1825_s16, %s1825_s16 }
   0xd   :  { %p1551_p7 = scmp.lt.s32.totalorder %s1851_s8, %s1545_s7 }
   0xf   :  { %p1552_p8 = por %p1551_p7, %p1550_p6 }
  0x11   :  { %p1553_p9 = pnand %p1552_p8, %p1546_p5 }
  0x13   :  { %1556 = shalt.err (!%p1553_p9)  }
  0x14   :  { %26 = dma.hbm_to_vmem [thread:$0]  %s2161_s3, 1024, %s1825_s16, [#allocation3] }
  0x15   :  { %s1863_s13 = scalar_lea.hbm %s2161_s3, 2048 }
  0x16   :  { %p1558_p10 = scmp.ne.s32.totalorder %s1815_s19, %s1863_s13  ;;  %p1561_p11 = scmp.lt.u32.totalorder %s1835_s30, %s1863_s13 }
  0x17   :  { %p1563_p13 = scmp.lt.u32.totalorder %s1863_s13, %s1815_s19 }
  0x18   :  { %p1562_p12 = por %p1561_p11, %p1539_p2 }
  0x1a   :  { %p1564_p0 = por %p1563_p13, %p1562_p12 }
  0x1c   :  { %p1565_p1 = pnand %p1564_p0, %p1558_p10 }
  0x1e   :  { %1568 = shalt.err (!%p1565_p1)  }
  0x1f   :  { %s1569_s17 = scalar_lea.vmem %s38_s25, 1024  ;;  %p1574_p4 = scmp.lt.s32.totalorder %s38_s25, %s1825_s16 }
  0x20   :  { %p1570_p3 = scmp.ne.s32.totalorder %s38_s25, %s1569_s17  ;;  %p1575_p5 = scmp.lt.s32.totalorder %s1851_s8, %s1569_s17 }
  0x22   :  { %p1576_p6 = por %p1575_p5, %p1574_p4 }
  0x24   :  { %p1577_p7 = pnand %p1576_p6, %p1570_p3 }
  0x26   :  { %1580 = shalt.err (!%p1577_p7)  }
  0x27   :  { %40 = dma.hbm_to_vmem [thread:$0]  %s1815_s19, 1024, %s38_s25, [#allocation3 + $0x1]  ;;  %v1884_v3 = vld [vmem:[#allocation4] sm:$0xff] }
  0x28   :  { %s1882_s21 = scalar_lea.hbm %s2161_s3, 3072  ;;  %s1778_s22 = smov [#allocation2 + $0x80]  }
  0x29   :  { %s51_s23 = sshll.u32 %s1778_s22, 4  ;;  %s1779_s24 = smov [#allocation2 + $0xc0]   ;;  %s52_s23 = int_to_ptr.vmem [resolvable:$true] %s51_s23 }
  0x2a   :  { %s65_s26 = sshll.u32 %s1779_s24, 4  ;;  %p1583_p2 = scmp.ne.s32.totalorder %s1863_s13, %s1882_s21  ;;  %s66_s26 = int_to_ptr.vmem [resolvable:$true] %s65_s26 }
  0x2b   :  { %p1585_p8 = scmp.lt.u32.totalorder %s1863_s13, %s2161_s3  ;;  %p1586_p9 = scmp.lt.u32.totalorder %s1835_s30, %s1882_s21 }
  0x2c   :  { %p1588_p11 = scmp.lt.u32.totalorder %s1882_s21, %s1863_s13 }
  0x2d   :  { %p1587_p10 = por %p1586_p9, %p1585_p8 }
  0x2f   :  { %p1589_p12 = por %p1588_p11, %p1587_p10 }
  0x31   :  { %p1590_p13 = pnand %p1589_p12, %p1583_p2 }
  0x33   :  { %1593 = shalt.err (!%p1590_p13)  }
  0x34   :  { %s1594_s19 = scalar_lea.vmem %s52_s23, 1024  ;;  %p1599_p1 = scmp.lt.s32.totalorder %s52_s23, %s1825_s16 }
  0x35   :  { %p1595_p0 = scmp.ne.s32.totalorder %s52_s23, %s1594_s19  ;;  %p1600_p3 = scmp.lt.s32.totalorder %s1851_s8, %s1594_s19 }
  0x37   :  { %p1601_p4 = por %p1600_p3, %p1599_p1 }
  0x39   :  { %p1602_p5 = pnand %p1601_p4, %p1595_p0 }
  0x3b   :  { %1605 = shalt.err (!%p1602_p5)  }
  0x3c   :  { %54 = dma.hbm_to_vmem [thread:$0]  %s1863_s13, 1024, %s52_s23, [#allocation3 + $0x2] }
  0x3d   :  { %s1902_s0 = scalar_lea.hbm %s2161_s3, 4096  ;;  %p1610_p7 = scmp.lt.u32.totalorder %s1882_s21, %s2161_s3 }
  0x3e   :  { %p1608_p6 = scmp.ne.s32.totalorder %s1882_s21, %s1902_s0  ;;  %p1611_p2 = scmp.lt.u32.totalorder %s1835_s30, %s1902_s0 }
  0x3f   :  { %p1613_p9 = scmp.lt.u32.totalorder %s1902_s0, %s1882_s21 }
  0x40   :  { %p1612_p8 = por %p1611_p2, %p1610_p7 }
  0x42   :  { %p1614_p10 = por %p1613_p9, %p1612_p8 }
  0x44   :  { %p1615_p11 = pnand %p1614_p10, %p1608_p6 }
  0x46   :  { %1618 = shalt.err (!%p1615_p11)  }
  0x47   :  { %s1619_s6 = scalar_lea.vmem %s66_s26, 1024  ;;  %p1624_p13 = scmp.lt.s32.totalorder %s66_s26, %s1825_s16 }
  0x48   :  { %p1620_p12 = scmp.ne.s32.totalorder %s66_s26, %s1619_s6  ;;  %p1625_p0 = scmp.lt.s32.totalorder %s1851_s8, %s1619_s6 }
  0x4a   :  { %p1626_p1 = por %p1625_p0, %p1624_p13 }
  0x4c   :  { %p1627_p3 = pnand %p1626_p1, %p1620_p12 }
  0x4e   :  { %1630 = shalt.err (!%p1627_p3)  }
  0x4f   :  { %68 = dma.hbm_to_vmem [thread:$0]  %s1882_s21, 1024, %s66_s26, [#allocation3 + $0x3] }
  0x50   :  { %s1920_s10 = scalar_lea.hbm %s2161_s3, 5120  ;;  %s1780_s11 = smov [#allocation2 + $0x100]  }
  0x51   :  { %s79_s12 = sshll.u32 %s1780_s11, 4  ;;  %s1781_s13 = smov [#allocation2 + $0x140]   ;;  %s80_s12 = int_to_ptr.vmem [resolvable:$true] %s79_s12 }
  0x52   :  { %s93_s14 = sshll.u32 %s1781_s13, 4  ;;  %p1633_p4 = scmp.ne.s32.totalorder %s1902_s0, %s1920_s10  ;;  %s94_s14 = int_to_ptr.vmem [resolvable:$true] %s93_s14 }
  0x53   :  { %p1635_p5 = scmp.lt.u32.totalorder %s1902_s0, %s2161_s3  ;;  %p1636_p6 = scmp.lt.u32.totalorder %s1835_s30, %s1920_s10 }
  0x54   :  { %p1638_p2 = scmp.lt.u32.totalorder %s1920_s10, %s1902_s0 }
  0x55   :  { %p1637_p7 = por %p1636_p6, %p1635_p5 }
  0x57   :  { %p1639_p8 = por %p1638_p2, %p1637_p7 }
  0x59   :  { %p1640_p9 = pnand %p1639_p8, %p1633_p4 }
  0x5b   :  { %1643 = shalt.err (!%p1640_p9)  }
  0x5c   :  { %s1644_s18 = scalar_lea.vmem %s80_s12, 1024  ;;  %p1649_p11 = scmp.lt.s32.totalorder %s80_s12, %s1825_s16 }
  0x5d   :  { %p1645_p10 = scmp.ne.s32.totalorder %s80_s12, %s1644_s18  ;;  %p1650_p12 = scmp.lt.s32.totalorder %s1851_s8, %s1644_s18 }
  0x5f   :  { %p1651_p13 = por %p1650_p12, %p1649_p11 }
  0x61   :  { %p1652_p0 = pnand %p1651_p13, %p1645_p10 }
  0x63   :  { %1655 = shalt.err (!%p1652_p0)  }
  0x64   :  { %82 = dma.hbm_to_vmem [thread:$0]  %s1902_s0, 1024, %s80_s12, [#allocation3 + $0x4] }
  0x65   :  { %s1938_s22 = scalar_lea.hbm %s2161_s3, 6144  ;;  %p1660_p3 = scmp.lt.u32.totalorder %s1920_s10, %s2161_s3 }
  0x66   :  { %p1658_p1 = scmp.ne.s32.totalorder %s1920_s10, %s1938_s22  ;;  %p1661_p4 = scmp.lt.u32.totalorder %s1835_s30, %s1938_s22 }
  0x67   :  { %p1663_p6 = scmp.lt.u32.totalorder %s1938_s22, %s1920_s10 }
  0x68   :  { %p1662_p5 = por %p1661_p4, %p1660_p3 }
  0x6a   :  { %p1664_p7 = por %p1663_p6, %p1662_p5 }
  0x6c   :  { %p1665_p2 = pnand %p1664_p7, %p1658_p1 }
  0x6e   :  { %1668 = shalt.err (!%p1665_p2)  }
  0x6f   :  { %s1669_s26 = scalar_lea.vmem %s94_s14, 1024  ;;  %p1674_p9 = scmp.lt.s32.totalorder %s94_s14, %s1825_s16 }
  0x70   :  { %p1670_p8 = scmp.ne.s32.totalorder %s94_s14, %s1669_s26  ;;  %p1675_p10 = scmp.lt.s32.totalorder %s1851_s8, %s1669_s26 }
  0x72   :  { %p1676_p11 = por %p1675_p10, %p1674_p9 }
  0x74   :  { %p1677_p12 = pnand %p1676_p11, %p1670_p8 }
  0x76   :  { %1680 = shalt.err (!%p1677_p12)  }
  0x77   :  { %96 = dma.hbm_to_vmem [thread:$0]  %s1920_s10, 1024, %s94_s14, [#allocation3 + $0x5] }
  0x78   :  { %s1956_s19 = scalar_lea.hbm %s2161_s3, 7168  ;;  %s1782_s25 = smov [#allocation2 + $0x180]  }
  0x79   :  { %s107_s29 = sshll.u32 %s1782_s25, 4  ;;  %s1783_s0 = smov [#allocation2 + $0x1c0]   ;;  %s108_s29 = int_to_ptr.vmem [resolvable:$true] %s107_s29 }
  0x7a   :  { %s121_s1 = sshll.u32 %s1783_s0, 4  ;;  %p1683_p13 = scmp.ne.s32.totalorder %s1938_s22, %s1956_s19  ;;  %s122_s1 = int_to_ptr.vmem [resolvable:$true] %s121_s1 }
  0x7b   :  { %p1685_p0 = scmp.lt.u32.totalorder %s1938_s22, %s2161_s3  ;;  %p1686_p1 = scmp.lt.u32.totalorder %s1835_s30, %s1956_s19 }
  0x7c   :  { %p1688_p4 = scmp.lt.u32.totalorder %s1956_s19, %s1938_s22 }
  0x7d   :  { %p1687_p3 = por %p1686_p1, %p1685_p0 }
  0x7f   :  { %p1689_p5 = por %p1688_p4, %p1687_p3 }
  0x81   :  { %p1690_p6 = pnand %p1689_p5, %p1683_p13 }
  0x83   :  { %1693 = shalt.err (!%p1690_p6)  }
  0x84   :  { %s1694_s7 = scalar_lea.vmem %s108_s29, 1024  ;;  %p1699_p2 = scmp.lt.s32.totalorder %s108_s29, %s1825_s16 }
  0x85   :  { %p1695_p7 = scmp.ne.s32.totalorder %s108_s29, %s1694_s7  ;;  %p1700_p8 = scmp.lt.s32.totalorder %s1851_s8, %s1694_s7 }
  0x87   :  { %p1701_p9 = por %p1700_p8, %p1699_p2 }
  0x89   :  { %p1702_p10 = pnand %p1701_p9, %p1695_p7 }
  0x8b   :  { %1705 = shalt.err (!%p1702_p10)  }
  0x8c   :  { %110 = dma.hbm_to_vmem [thread:$0]  %s1938_s22, 1024, %s108_s29, [#allocation3 + $0x6] }
  0x8d   :  { %s1974_s11 = scalar_lea.hbm %s2161_s3, 8192  ;;  %p1710_p12 = scmp.lt.u32.totalorder %s1956_s19, %s2161_s3 }
  0x8e   :  { %p1708_p11 = scmp.ne.s32.totalorder %s1956_s19, %s1974_s11  ;;  %p1711_p13 = scmp.lt.u32.totalorder %s1835_s30, %s1974_s11 }
  0x8f   :  { %p1713_p1 = scmp.lt.u32.totalorder %s1974_s11, %s1956_s19 }
  0x90   :  { %p1712_p0 = por %p1711_p13, %p1710_p12 }
  0x92   :  { %p1714_p3 = por %p1713_p1, %p1712_p0 }
  0x94   :  { %p1715_p4 = pnand %p1714_p3, %p1708_p11 }
  0x96   :  { %1718 = shalt.err (!%p1715_p4)  }
  0x97   :  { %s1719_s14 = scalar_lea.vmem %s122_s1, 1024  ;;  %p1724_p6 = scmp.lt.s32.totalorder %s122_s1, %s1825_s16 }
  0x98   :  { %p1720_p5 = scmp.ne.s32.totalorder %s122_s1, %s1719_s14  ;;  %p1725_p7 = scmp.lt.s32.totalorder %s1851_s8, %s1719_s14 }
  0x9a   :  { %p1726_p2 = por %p1725_p7, %p1724_p6 }
  0x9c   :  { %p1727_p8 = pnand %p1726_p2, %p1720_p5 }
  0x9e   :  { %1730 = shalt.err (!%p1727_p8)  }
  0x9f   :  { %124 = dma.hbm_to_vmem [thread:$0]  %s1956_s19, 1024, %s122_s1, [#allocation3 + $0x7] }
  0xa0   :  { %s1784_s15 = smov [#allocation2 + $0x200]   ;;  %p1733_p9 = scmp.ne.s32.totalorder %s1974_s11, %s1835_s30 }
  0xa1   :  { %s135_s17 = sshll.u32 %s1784_s15, 4  ;;  %p1735_p10 = scmp.lt.u32.totalorder %s1974_s11, %s2161_s3  ;;  %s136_s17 = int_to_ptr.vmem [resolvable:$true] %s135_s17 }
  0xa2   :  { %p1736_p11 = scmp.lt.u32.totalorder %s1835_s30, %s1835_s30 }
  0xa4   :  { %p1737_p12 = por %p1736_p11, %p1735_p10 }
  0xa6   :  { %p1739_p0 = por %p1737_p12, %p1711_p13 }
  0xa8   :  { %p1740_p1 = pnand %p1739_p0, %p1733_p9 }
  0xaa   :  { %1743 = shalt.err (!%p1740_p1)  }
  0xab   :  { %s1744_s21 = scalar_lea.vmem %s136_s17, 1024  ;;  %p1749_p4 = scmp.lt.s32.totalorder %s136_s17, %s1825_s16 }
  0xac   :  { %p1745_p3 = scmp.ne.s32.totalorder %s136_s17, %s1744_s21  ;;  %p1750_p5 = scmp.lt.s32.totalorder %s1851_s8, %s1744_s21 }
  0xae   :  { %p1751_p6 = por %p1750_p5, %p1749_p4 }
  0xb0   :  { %p1752_p7 = pnand %p1751_p6, %p1745_p3 }
  0xb2   :  { %1755 = shalt.err (!%p1752_p7)  }
  0xb3   :  { %138 = dma.hbm_to_vmem [thread:$0]  %s1974_s11, 1024, %s136_s17, [#allocation3 + $0x8] }
  0xb4   :  { %1757 = dma.done.wait [#allocation3], 1024 }
  0xb5   :  { %1758 = vsyncadd [#allocation3], 4294966272  ;;  %1312 = vmatprep.subr.bf16.mxu0 %v1776_v0  ;;  %vm1785_vm1 = vmmov 0   ;;  %v149_v4 = vld [vmem:[#allocation2] sm:$0xff]  ;;  %v150_v5 = vld [vmem:[#allocation2 + $0x8] sm:$0xff]  ;;  %v157_v12 = vpack.c.bf16 %v1884_v3, %v1884_v3  ;;  %vm205_vm2 = vcmask 64512  }
  0xb6   :  { %1328 = vmatprep.mubr.msk.bf16.mxu0 %vm1785_vm1, %v1776_v0  ;;  %1313 = vmatpush3.bf16.msra.mxu0 %v149_v4  ;;  %v151_v6 = vld [vmem:[#allocation2 + $0x10] sm:$0xff]  ;;  %v152_v7 = vld [vmem:[#allocation2 + $0x18] sm:$0xff]  ;;  %v153_v8 = vld [vmem:[#allocation2 + $0x20] sm:$0xff] }
  0xb7   :  { %1314 = vmatprep.subr.bf16.mxu0 %v1776_v0  ;;  %v154_v9 = vld [vmem:[#allocation2 + $0x28] sm:$0xff]  ;;  %v155_v10 = vld [vmem:[#allocation2 + $0x30] sm:$0xff]  ;;  %v156_v11 = vld [vmem:[#allocation2 + $0x38] sm:$0xff] }
  0xb8   :  { %v1187_v17 = vld [vmem:[%s2160_s2] ss:$0 sm:$0xff] }
  0xba   :  { %1315 = vmatpush3.bf16.msra.mxu0 %v150_v5 }
  0xbb   :  { %1316 = vmatprep.subr.bf16.mxu0 %v1776_v0 }
  0xbe   :  { %1317 = vmatpush3.bf16.msra.mxu0 %v151_v6 }
  0xbf   :  { %1318 = vmatprep.subr.bf16.mxu0 %v1776_v0 }
  0xc2   :  { %1319 = vmatpush3.bf16.msra.mxu0 %v152_v7 }
  0xc3   :  { %1320 = vmatprep.subr.bf16.mxu0 %v1776_v0 }
  0xc6   :  { %1321 = vmatpush3.bf16.msra.mxu0 %v153_v8 }
  0xc7   :  { %1322 = vmatprep.subr.bf16.mxu0 %v1776_v0 }
  0xca   :  { %1323 = vmatpush3.bf16.msra.mxu0 %v154_v9 }
  0xcb   :  { %1324 = vmatprep.subr.bf16.mxu0 %v1776_v0 }
  0xce   :  { %1325 = vmatpush3.bf16.msra.mxu0 %v155_v10 }
  0xcf   :  { %1326 = vmatprep.subr.bf16.mxu0 %v1776_v0 }
  0xd2   :  { %1327 = vmatpush3.bf16.msra.mxu0 %v156_v11 }
  0xd3   :  { %1332 = vmatprep.subr.mxu0 %v1776_v0 }
  0xd5   :  { %1329 = vmatmul.mubr.bf16.vlgmr.msra.gmra.mrb[0].mxu0 %v157_v12 }
  0xd6   :  { %1334 = vmatprep.mubr.msk.f32.mxu0 %vm1785_vm1, %v1776_v0 }
 0x1a8   :  { %v192_v13 = vpop.f32.mrb[0].mxu0 }
 0x1a9   :  { %v1330_v14 = vpop.f32.mrb[1].mxu0  ;;  %1333 = vmatpush3.msra.mxu0 %v192_v13 }
 0x1aa   :  { %v195_v15 = vpop.f32.mrb[2].mxu0  ;;  %1335 = vmatmul.mubr.msk.f32.vlgmr.msra.gmra.mrb[4].mxu0 %vm205_vm2, %v1823_v2 }
 0x1ab   :  { %v1331_v16 = vpop.f32.mrb[3].mxu0 }
 0x27d   :  { %v275_v18 = vpop.f32.mrb[4].mxu0 }
 0x27e   :  { %v276_v19 = vadd.f32 %v1187_v17, %v275_v18  ;;  %v1336_v20 = vpop.f32.mrb[5].mxu0 }
 0x280   :  { %v279_v21 = vmul.f32 0.01, %v276_v19 }
 0x282   :  { %v280_v22 = vmax.f32 %v276_v19, %v279_v21 }
 0x283   :  { %1759 = dma.done.wait [#allocation3 + $0x1], 1024 }
 0x284   :  { %1760 = vsyncadd [#allocation3 + $0x1], 4294966272  ;;  %1337 = vmatprep.subr.bf16.mxu1 %v1776_v0  ;;  %1353 = vmatprep.mubr.msk.bf16.mxu1 %vm1785_vm1, %v1776_v0  ;;  %v283_v23 = vld [vmem:[#allocation2 + $0x40] sm:$0xff]  ;;  %v284_v24 = vld [vmem:[#allocation2 + $0x48] sm:$0xff]  ;;  %v291_v31 = vpack.c.bf16 %v280_v22, %v280_v22 }
 0x285   :  { %1357 = vmatprep.subr.mxu0 %v1776_v0  ;;  %1359 = vmatprep.mubr.msk.f32.mxu0 %vm1785_vm1, %v1776_v0  ;;  %v285_v25 = vld [vmem:[#allocation2 + $0x50] sm:$0xff]  ;;  %v286_v26 = vld [vmem:[#allocation2 + $0x58] sm:$0xff]  ;;  %v287_v27 = vld [vmem:[#allocation2 + $0x60] sm:$0xff] }
 0x286   :  { %1338 = vmatpush3.bf16.msra.mxu1 %v283_v23  ;;  %v288_v28 = vld [vmem:[#allocation2 + $0x68] sm:$0xff]  ;;  %v289_v29 = vld [vmem:[#allocation2 + $0x70] sm:$0xff]  ;;  %v290_v30 = vld [vmem:[#allocation2 + $0x78] sm:$0xff] }
 0x287   :  { %1339 = vmatprep.subr.bf16.mxu1 %v1776_v0  ;;  %v1190_v36 = vld [vmem:[%s2160_s2 + $0x1] ss:$0 sm:$0xff] }
 0x28a   :  { %1340 = vmatpush3.bf16.msra.mxu1 %v284_v24 }
 0x28b   :  { %1341 = vmatprep.subr.bf16.mxu1 %v1776_v0 }
 0x28e   :  { %1342 = vmatpush3.bf16.msra.mxu1 %v285_v25 }
 0x28f   :  { %1343 = vmatprep.subr.bf16.mxu1 %v1776_v0 }
 0x292   :  { %1344 = vmatpush3.bf16.msra.mxu1 %v286_v26 }
 0x293   :  { %1345 = vmatprep.subr.bf16.mxu1 %v1776_v0 }
 0x296   :  { %1346 = vmatpush3.bf16.msra.mxu1 %v287_v27 }
 0x297   :  { %1347 = vmatprep.subr.bf16.mxu1 %v1776_v0 }
 0x29a   :  { %1348 = vmatpush3.bf16.msra.mxu1 %v288_v28 }
 0x29b   :  { %1349 = vmatprep.subr.bf16.mxu1 %v1776_v0 }
 0x29e   :  { %1350 = vmatpush3.bf16.msra.mxu1 %v289_v29 }
 0x29f   :  { %1351 = vmatprep.subr.bf16.mxu1 %v1776_v0 }
 0x2a2   :  { %1352 = vmatpush3.bf16.msra.mxu1 %v290_v30 }
 0x2a5   :  { %1354 = vmatmul.mubr.bf16.vlgmr.msra.gmra.mrb[0].mxu1 %v291_v31 }
 0x378   :  { %v326_v32 = vpop.f32.mrb[0].mxu1 }
 0x379   :  { %v1355_v33 = vpop.f32.mrb[1].mxu1  ;;  %1358 = vmatpush3.msra.mxu0 %v326_v32 }
 0x37a   :  { %v329_v34 = vpop.f32.mrb[2].mxu1  ;;  %1360 = vmatmul.mubr.msk.f32.vlgmr.msra.gmra.mrb[6].mxu0 %vm205_vm2, %v1823_v2 }
 0x37b   :  { %v1356_v35 = vpop.f32.mrb[3].mxu1 }
 0x44d   :  { %v406_v37 = vpop.f32.mrb[6].mxu0 }
 0x44e   :  { %v407_v38 = vadd.f32 %v1190_v36, %v406_v37  ;;  %v1361_v39 = vpop.f32.mrb[7].mxu0 }
 0x450   :  { %v410_v40 = vmul.f32 0.01, %v407_v38 }
 0x452   :  { %v411_v41 = vmax.f32 %v407_v38, %v410_v40 }
 0x453   :  { %1761 = dma.done.wait [#allocation3 + $0x2], 1024 }
 0x454   :  { %1762 = vsyncadd [#allocation3 + $0x2], 4294966272  ;;  %1362 = vmatprep.subr.bf16.mxu1 %v1776_v0  ;;  %1378 = vmatprep.mubr.msk.bf16.mxu1 %vm1785_vm1, %v1776_v0  ;;  %v414_v42 = vld [vmem:[#allocation2 + $0x80] sm:$0xff]  ;;  %v415_v43 = vld [vmem:[#allocation2 + $0x88] sm:$0xff]  ;;  %v422_v50 = vpack.c.bf16 %v411_v41, %v411_v41 }
 0x455   :  { %1382 = vmatprep.subr.mxu0 %v1776_v0  ;;  %1384 = vmatprep.mubr.msk.f32.mxu0 %vm1785_vm1, %v1776_v0  ;;  %v416_v44 = vld [vmem:[#allocation2 + $0x90] sm:$0xff]  ;;  %v417_v45 = vld [vmem:[#allocation2 + $0x98] sm:$0xff]  ;;  %v418_v46 = vld [vmem:[#allocation2 + $0xa0] sm:$0xff] }
 0x456   :  { %1363 = vmatpush3.bf16.msra.mxu1 %v414_v42  ;;  %v419_v47 = vld [vmem:[#allocation2 + $0xa8] sm:$0xff]  ;;  %v420_v48 = vld [vmem:[#allocation2 + $0xb0] sm:$0xff]  ;;  %v421_v49 = vld [vmem:[#allocation2 + $0xb8] sm:$0xff] }
 0x457   :  { %1364 = vmatprep.subr.bf16.mxu1 %v1776_v0  ;;  %v1193_v55 = vld [vmem:[%s2160_s2 + $0x2] ss:$0 sm:$0xff] }
 0x45a   :  { %1365 = vmatpush3.bf16.msra.mxu1 %v415_v43 }
 0x45b   :  { %1366 = vmatprep.subr.bf16.mxu1 %v1776_v0 }
 0x45e   :  { %1367 = vmatpush3.bf16.msra.mxu1 %v416_v44 }
 0x45f   :  { %1368 = vmatprep.subr.bf16.mxu1 %v1776_v0 }
 0x462   :  { %1369 = vmatpush3.bf16.msra.mxu1 %v417_v45 }
 0x463   :  { %1370 = vmatprep.subr.bf16.mxu1 %v1776_v0 }
 0x466   :  { %1371 = vmatpush3.bf16.msra.mxu1 %v418_v46 }
 0x467   :  { %1372 = vmatprep.subr.bf16.mxu1 %v1776_v0 }
 0x46a   :  { %1373 = vmatpush3.bf16.msra.mxu1 %v419_v47 }
 0x46b   :  { %1374 = vmatprep.subr.bf16.mxu1 %v1776_v0 }
 0x46e   :  { %1375 = vmatpush3.bf16.msra.mxu1 %v420_v48 }
 0x46f   :  { %1376 = vmatprep.subr.bf16.mxu1 %v1776_v0 }
 0x472   :  { %1377 = vmatpush3.bf16.msra.mxu1 %v421_v49 }
 0x475   :  { %1379 = vmatmul.mubr.bf16.vlgmr.msra.gmra.mrb[4].mxu1 %v422_v50 }
 0x548   :  { %v457_v51 = vpop.f32.mrb[4].mxu1 }
 0x549   :  { %v1380_v52 = vpop.f32.mrb[5].mxu1  ;;  %1383 = vmatpush3.msra.mxu0 %v457_v51 }
 0x54a   :  { %v460_v53 = vpop.f32.mrb[6].mxu1  ;;  %1385 = vmatmul.mubr.msk.f32.vlgmr.msra.gmra.mrb[8].mxu0 %vm205_vm2, %v1823_v2 }
 0x54b   :  { %v1381_v54 = vpop.f32.mrb[7].mxu1 }
 0x61d   :  { %v537_v56 = vpop.f32.mrb[8].mxu0 }
 0x61e   :  { %v538_v57 = vadd.f32 %v1193_v55, %v537_v56  ;;  %v1386_v58 = vpop.f32.mrb[9].mxu0 }
 0x620   :  { %v541_v59 = vmul.f32 0.01, %v538_v57 }
 0x622   :  { %v542_v60 = vmax.f32 %v538_v57, %v541_v59 }
 0x623   :  { %1763 = dma.done.wait [#allocation3 + $0x3], 1024 }
 0x624   :  { %1764 = vsyncadd [#allocation3 + $0x3], 4294966272  ;;  %1387 = vmatprep.subr.bf16.mxu0 %v1776_v0  ;;  %1403 = vmatprep.mubr.msk.bf16.mxu0 %vm1785_vm1, %v1776_v0  ;;  %v545_v61 = vld [vmem:[#allocation2 + $0xc0] sm:$0xff]  ;;  %v546_v62 = vld [vmem:[#allocation2 + $0xc8] sm:$0xff]  ;;  %v553_v7 = vpack.c.bf16 %v542_v60, %v542_v60 }
 0x625   :  { %1388 = vmatpush3.bf16.msra.mxu0 %v545_v61  ;;  %v547_v63 = vld [vmem:[#allocation2 + $0xd0] sm:$0xff]  ;;  %v548_v1 = vld [vmem:[#allocation2 + $0xd8] sm:$0xff]  ;;  %v549_v3 = vld [vmem:[#allocation2 + $0xe0] sm:$0xff] }
 0x626   :  { %1389 = vmatprep.subr.bf16.mxu0 %v1776_v0  ;;  %v550_v4 = vld [vmem:[#allocation2 + $0xe8] sm:$0xff]  ;;  %v551_v5 = vld [vmem:[#allocation2 + $0xf0] sm:$0xff]  ;;  %v552_v6 = vld [vmem:[#allocation2 + $0xf8] sm:$0xff] }
 0x627   :  { %v1196_v8 = vld [vmem:[%s2160_s2 + $0x3] ss:$0 sm:$0xff] }
 0x629   :  { %1390 = vmatpush3.bf16.msra.mxu0 %v546_v62 }
 0x62a   :  { %1391 = vmatprep.subr.bf16.mxu0 %v1776_v0 }
 0x62d   :  { %1392 = vmatpush3.bf16.msra.mxu0 %v547_v63 }
 0x62e   :  { %1393 = vmatprep.subr.bf16.mxu0 %v1776_v0 }
 0x631   :  { %1394 = vmatpush3.bf16.msra.mxu0 %v548_v1 }
 0x632   :  { %1395 = vmatprep.subr.bf16.mxu0 %v1776_v0 }
 0x635   :  { %1396 = vmatpush3.bf16.msra.mxu0 %v549_v3 }
 0x636   :  { %1397 = vmatprep.subr.bf16.mxu0 %v1776_v0 }
 0x639   :  { %1398 = vmatpush3.bf16.msra.mxu0 %v550_v4 }
 0x63a   :  { %1399 = vmatprep.subr.bf16.mxu0 %v1776_v0 }
 0x63d   :  { %1400 = vmatpush3.bf16.msra.mxu0 %v551_v5 }
 0x63e   :  { %1401 = vmatprep.subr.bf16.mxu0 %v1776_v0 }
 0x641   :  { %1402 = vmatpush3.bf16.msra.mxu0 %v552_v6 }
 0x644   :  { %1404 = vmatmul.mubr.bf16.vlgmr.msra.gmra.mrb[12].mxu0 %v553_v7 }
 0x717   :  { %v596_v9 = vpop.f32.mrb[12].mxu0 }
 0x718   :  { %v597_v10 = vadd.f32 %v1196_v8, %v596_v9  ;;  %v1405_v11 = vpop.f32.mrb[13].mxu0 }
 0x719   :  { %v599_v12 = vpop.f32.mrb[14].mxu0 }
 0x71a   :  { %v602_v13 = vmul.f32 0.01, %v597_v10  ;;  %v1406_v14 = vpop.f32.mrb[15].mxu0 }
 0x71c   :  { %v603_v15 = vmax.f32 %v597_v10, %v602_v13 }
 0x71d   :  { %1765 = dma.done.wait [#allocation3 + $0x4], 1024 }
 0x71e   :  { %1766 = vsyncadd [#allocation3 + $0x4], 4294966272  ;;  %1407 = vmatprep.subr.bf16.mxu1 %v1776_v0  ;;  %1423 = vmatprep.mubr.msk.bf16.mxu1 %vm1785_vm1, %v1776_v0  ;;  %v606_v16 = vld [vmem:[#allocation2 + $0x100] sm:$0xff]  ;;  %v607_v17 = vld [vmem:[#allocation2 + $0x108] sm:$0xff]  ;;  %v614_v24 = vpack.c.bf16 %v603_v15, %v603_v15 }
 0x71f   :  { %1408 = vmatpush3.bf16.msra.mxu1 %v606_v16  ;;  %v608_v18 = vld [vmem:[#allocation2 + $0x110] sm:$0xff]  ;;  %v609_v19 = vld [vmem:[#allocation2 + $0x118] sm:$0xff]  ;;  %v610_v20 = vld [vmem:[#allocation2 + $0x120] sm:$0xff] }
 0x720   :  { %1409 = vmatprep.subr.bf16.mxu1 %v1776_v0  ;;  %v611_v21 = vld [vmem:[#allocation2 + $0x128] sm:$0xff]  ;;  %v612_v22 = vld [vmem:[#allocation2 + $0x130] sm:$0xff]  ;;  %v613_v23 = vld [vmem:[#allocation2 + $0x138] sm:$0xff] }
 0x721   :  { %v1198_v25 = vld [vmem:[%s2160_s2 + $0x4] ss:$0 sm:$0xff] }
 0x723   :  { %1410 = vmatpush3.bf16.msra.mxu1 %v607_v17 }
 0x724   :  { %1411 = vmatprep.subr.bf16.mxu1 %v1776_v0 }
 0x727   :  { %1412 = vmatpush3.bf16.msra.mxu1 %v608_v18 }
 0x728   :  { %1413 = vmatprep.subr.bf16.mxu1 %v1776_v0 }
 0x72b   :  { %1414 = vmatpush3.bf16.msra.mxu1 %v609_v19 }
 0x72c   :  { %1415 = vmatprep.subr.bf16.mxu1 %v1776_v0 }
 0x72f   :  { %1416 = vmatpush3.bf16.msra.mxu1 %v610_v20 }
 0x730   :  { %1417 = vmatprep.subr.bf16.mxu1 %v1776_v0 }
 0x733   :  { %1418 = vmatpush3.bf16.msra.mxu1 %v611_v21 }
 0x734   :  { %1419 = vmatprep.subr.bf16.mxu1 %v1776_v0 }
 0x737   :  { %1420 = vmatpush3.bf16.msra.mxu1 %v612_v22 }
 0x738   :  { %1421 = vmatprep.subr.bf16.mxu1 %v1776_v0 }
 0x73b   :  { %1422 = vmatpush3.bf16.msra.mxu1 %v613_v23 }
 0x73e   :  { %1424 = vmatmul.mubr.bf16.vlgmr.msra.gmra.mrb[8].mxu1 %v614_v24 }
 0x811   :  { %v657_v26 = vpop.f32.mrb[8].mxu1 }
 0x812   :  { %v658_v27 = vadd.f32 %v1198_v25, %v657_v26  ;;  %v1425_v28 = vpop.f32.mrb[9].mxu1 }
 0x813   :  { %v660_v29 = vpop.f32.mrb[10].mxu1 }
 0x814   :  { %v663_v30 = vmul.f32 0.01, %v658_v27  ;;  %v1426_v31 = vpop.f32.mrb[11].mxu1 }
 0x816   :  { %v664_v32 = vmax.f32 %v658_v27, %v663_v30 }
 0x817   :  { %1767 = dma.done.wait [#allocation3 + $0x5], 1024 }
 0x818   :  { %1768 = vsyncadd [#allocation3 + $0x5], 4294966272  ;;  %1427 = vmatprep.subr.bf16.mxu0 %v1776_v0  ;;  %1443 = vmatprep.mubr.msk.bf16.mxu0 %vm1785_vm1, %v1776_v0  ;;  %v667_v33 = vld [vmem:[#allocation2 + $0x140] sm:$0xff]  ;;  %v668_v34 = vld [vmem:[#allocation2 + $0x148] sm:$0xff]  ;;  %v675_v41 = vpack.c.bf16 %v664_v32, %v664_v32 }
 0x819   :  { %1428 = vmatpush3.bf16.msra.mxu0 %v667_v33  ;;  %v669_v35 = vld [vmem:[#allocation2 + $0x150] sm:$0xff]  ;;  %v670_v36 = vld [vmem:[#allocation2 + $0x158] sm:$0xff]  ;;  %v671_v37 = vld [vmem:[#allocation2 + $0x160] sm:$0xff] }
 0x81a   :  { %1429 = vmatprep.subr.bf16.mxu0 %v1776_v0  ;;  %v672_v38 = vld [vmem:[#allocation2 + $0x168] sm:$0xff]  ;;  %v673_v39 = vld [vmem:[#allocation2 + $0x170] sm:$0xff]  ;;  %v674_v40 = vld [vmem:[#allocation2 + $0x178] sm:$0xff] }
 0x81b   :  { %v1200_v42 = vld [vmem:[%s2160_s2 + $0x5] ss:$0 sm:$0xff] }
 0x81d   :  { %1430 = vmatpush3.bf16.msra.mxu0 %v668_v34 }
 0x81e   :  { %1431 = vmatprep.subr.bf16.mxu0 %v1776_v0 }
 0x821   :  { %1432 = vmatpush3.bf16.msra.mxu0 %v669_v35 }
 0x822   :  { %1433 = vmatprep.subr.bf16.mxu0 %v1776_v0 }
 0x825   :  { %1434 = vmatpush3.bf16.msra.mxu0 %v670_v36 }
 0x826   :  { %1435 = vmatprep.subr.bf16.mxu0 %v1776_v0 }
 0x829   :  { %1436 = vmatpush3.bf16.msra.mxu0 %v671_v37 }
 0x82a   :  { %1437 = vmatprep.subr.bf16.mxu0 %v1776_v0 }
 0x82d   :  { %1438 = vmatpush3.bf16.msra.mxu0 %v672_v38 }
 0x82e   :  { %1439 = vmatprep.subr.bf16.mxu0 %v1776_v0 }
 0x831   :  { %1440 = vmatpush3.bf16.msra.mxu0 %v673_v39 }
 0x832   :  { %1441 = vmatprep.subr.bf16.mxu0 %v1776_v0 }
 0x835   :  { %1442 = vmatpush3.bf16.msra.mxu0 %v674_v40 }
 0x838   :  { %1444 = vmatmul.mubr.bf16.vlgmr.msra.gmra.mrb[16].mxu0 %v675_v41 }
 0x90b   :  { %v718_v43 = vpop.f32.mrb[16].mxu0 }
 0x90c   :  { %v719_v44 = vadd.f32 %v1200_v42, %v718_v43  ;;  %v1445_v45 = vpop.f32.mrb[17].mxu0 }
 0x90d   :  { %v721_v46 = vpop.f32.mrb[18].mxu0 }
 0x90e   :  { %v724_v47 = vmul.f32 0.01, %v719_v44  ;;  %v1446_v48 = vpop.f32.mrb[19].mxu0 }
 0x910   :  { %v725_v49 = vmax.f32 %v719_v44, %v724_v47 }
 0x911   :  { %1769 = dma.done.wait [#allocation3 + $0x6], 1024 }
 0x912   :  { %1770 = vsyncadd [#allocation3 + $0x6], 4294966272  ;;  %1447 = vmatprep.subr.bf16.mxu1 %v1776_v0  ;;  %1463 = vmatprep.mubr.msk.bf16.mxu1 %vm1785_vm1, %v1776_v0  ;;  %v728_v50 = vld [vmem:[#allocation2 + $0x180] sm:$0xff]  ;;  %v729_v51 = vld [vmem:[#allocation2 + $0x188] sm:$0xff]  ;;  %v736_v58 = vpack.c.bf16 %v725_v49, %v725_v49 }
 0x913   :  { %1467 = vmatprep.subr.mxu0 %v1776_v0  ;;  %1469 = vmatprep.mubr.msk.f32.mxu0 %vm1785_vm1, %v1776_v0  ;;  %v730_v52 = vld [vmem:[#allocation2 + $0x190] sm:$0xff]  ;;  %v731_v53 = vld [vmem:[#allocation2 + $0x198] sm:$0xff]  ;;  %v732_v54 = vld [vmem:[#allocation2 + $0x1a0] sm:$0xff] }
 0x914   :  { %1448 = vmatpush3.bf16.msra.mxu1 %v728_v50  ;;  %v733_v55 = vld [vmem:[#allocation2 + $0x1a8] sm:$0xff]  ;;  %v734_v56 = vld [vmem:[#allocation2 + $0x1b0] sm:$0xff]  ;;  %v735_v57 = vld [vmem:[#allocation2 + $0x1b8] sm:$0xff] }
 0x915   :  { %1449 = vmatprep.subr.bf16.mxu1 %v1776_v0  ;;  %v1202_v63 = vld [vmem:[%s2160_s2 + $0x6] ss:$0 sm:$0xff] }
 0x918   :  { %1450 = vmatpush3.bf16.msra.mxu1 %v729_v51 }
 0x919   :  { %1451 = vmatprep.subr.bf16.mxu1 %v1776_v0 }
 0x91c   :  { %1452 = vmatpush3.bf16.msra.mxu1 %v730_v52 }
 0x91d   :  { %1453 = vmatprep.subr.bf16.mxu1 %v1776_v0 }
 0x920   :  { %1454 = vmatpush3.bf16.msra.mxu1 %v731_v53 }
 0x921   :  { %1455 = vmatprep.subr.bf16.mxu1 %v1776_v0 }
 0x924   :  { %1456 = vmatpush3.bf16.msra.mxu1 %v732_v54 }
 0x925   :  { %1457 = vmatprep.subr.bf16.mxu1 %v1776_v0 }
 0x928   :  { %1458 = vmatpush3.bf16.msra.mxu1 %v733_v55 }
 0x929   :  { %1459 = vmatprep.subr.bf16.mxu1 %v1776_v0 }
 0x92c   :  { %1460 = vmatpush3.bf16.msra.mxu1 %v734_v56 }
 0x92d   :  { %1461 = vmatprep.subr.bf16.mxu1 %v1776_v0 }
 0x930   :  { %1462 = vmatpush3.bf16.msra.mxu1 %v735_v57 }
 0x933   :  { %1464 = vmatmul.mubr.bf16.vlgmr.msra.gmra.mrb[12].mxu1 %v736_v58 }
 0xa06   :  { %v771_v59 = vpop.f32.mrb[12].mxu1 }
 0xa07   :  { %v1465_v60 = vpop.f32.mrb[13].mxu1  ;;  %1468 = vmatpush3.msra.mxu0 %v771_v59 }
 0xa08   :  { %v774_v61 = vpop.f32.mrb[14].mxu1  ;;  %1470 = vmatmul.mubr.msk.f32.vlgmr.msra.gmra.mrb[10].mxu0 %vm205_vm2, %v1823_v2 }
 0xa09   :  { %v1466_v62 = vpop.f32.mrb[15].mxu1 }
 0xadb   :  { %v851_v1 = vpop.f32.mrb[10].mxu0 }
 0xadc   :  { %v852_v3 = vadd.f32 %v1202_v63, %v851_v1  ;;  %v1471_v4 = vpop.f32.mrb[11].mxu0 }
 0xade   :  { %v855_v5 = vmul.f32 0.01, %v852_v3 }
 0xae0   :  { %v856_v6 = vmax.f32 %v852_v3, %v855_v5 }
 0xae1   :  { %1771 = dma.done.wait [#allocation3 + $0x7], 1024 }
 0xae2   :  { %1772 = vsyncadd [#allocation3 + $0x7], 4294966272  ;;  %1472 = vmatprep.subr.bf16.mxu0 %v1776_v0  ;;  %1488 = vmatprep.mubr.msk.bf16.mxu0 %vm1785_vm1, %v1776_v0  ;;  %v859_v7 = vld [vmem:[#allocation2 + $0x1c0] sm:$0xff]  ;;  %v860_v8 = vld [vmem:[#allocation2 + $0x1c8] sm:$0xff]  ;;  %v867_v15 = vpack.c.bf16 %v856_v6, %v856_v6 }
 0xae3   :  { %1473 = vmatpush3.bf16.msra.mxu0 %v859_v7  ;;  %v861_v9 = vld [vmem:[#allocation2 + $0x1d0] sm:$0xff]  ;;  %v862_v10 = vld [vmem:[#allocation2 + $0x1d8] sm:$0xff]  ;;  %v863_v11 = vld [vmem:[#allocation2 + $0x1e0] sm:$0xff] }
 0xae4   :  { %1474 = vmatprep.subr.bf16.mxu0 %v1776_v0  ;;  %v864_v12 = vld [vmem:[#allocation2 + $0x1e8] sm:$0xff]  ;;  %v865_v13 = vld [vmem:[#allocation2 + $0x1f0] sm:$0xff]  ;;  %v866_v14 = vld [vmem:[#allocation2 + $0x1f8] sm:$0xff] }
 0xae5   :  { %v1205_v20 = vld [vmem:[%s2160_s2 + $0x7] ss:$0 sm:$0xff] }
 0xae7   :  { %1475 = vmatpush3.bf16.msra.mxu0 %v860_v8 }
 0xae8   :  { %1476 = vmatprep.subr.bf16.mxu0 %v1776_v0 }
 0xaeb   :  { %1477 = vmatpush3.bf16.msra.mxu0 %v861_v9 }
 0xaec   :  { %1478 = vmatprep.subr.bf16.mxu0 %v1776_v0 }
 0xaef   :  { %1479 = vmatpush3.bf16.msra.mxu0 %v862_v10 }
 0xaf0   :  { %1480 = vmatprep.subr.bf16.mxu0 %v1776_v0 }
 0xaf3   :  { %1481 = vmatpush3.bf16.msra.mxu0 %v863_v11 }
 0xaf4   :  { %1482 = vmatprep.subr.bf16.mxu0 %v1776_v0 }
 0xaf7   :  { %1483 = vmatpush3.bf16.msra.mxu0 %v864_v12 }
 0xaf8   :  { %1484 = vmatprep.subr.bf16.mxu0 %v1776_v0 }
 0xafb   :  { %1485 = vmatpush3.bf16.msra.mxu0 %v865_v13 }
 0xafc   :  { %1486 = vmatprep.subr.bf16.mxu0 %v1776_v0 }
 0xaff   :  { %1487 = vmatpush3.bf16.msra.mxu0 %v866_v14 }
 0xb00   :  { %1492 = vmatprep.subr.mxu0 %v1776_v0 }
 0xb02   :  { %1489 = vmatmul.mubr.bf16.vlgmr.msra.gmra.mrb[20].mxu0 %v867_v15 }
 0xb03   :  { %1494 = vmatprep.mubr.msk.f32.mxu0 %vm1785_vm1, %v1776_v0 }
 0xbd5   :  { %v902_v16 = vpop.f32.mrb[20].mxu0 }
 0xbd6   :  { %v1490_v17 = vpop.f32.mrb[21].mxu0  ;;  %1493 = vmatpush3.msra.mxu0 %v902_v16 }
 0xbd7   :  { %v905_v18 = vpop.f32.mrb[22].mxu0  ;;  %1495 = vmatmul.mubr.msk.f32.vlgmr.msra.gmra.mrb[24].mxu0 %vm205_vm2, %v1823_v2 }
 0xbd8   :  { %v1491_v19 = vpop.f32.mrb[23].mxu0 }
 0xcaa   :  { %v982_v21 = vpop.f32.mrb[24].mxu0 }
 0xcab   :  { %v983_v22 = vadd.f32 %v1205_v20, %v982_v21  ;;  %v1496_v23 = vpop.f32.mrb[25].mxu0 }
 0xcad   :  { %v986_v24 = vmul.f32 0.01, %v983_v22 }
 0xcaf   :  { %v987_v25 = vmax.f32 %v983_v22, %v986_v24 }
 0xcb0   :  { %1773 = dma.done.wait [#allocation3 + $0x8], 1024 }
 0xcb1   :  { %1774 = vsyncadd [#allocation3 + $0x8], 4294966272  ;;  %1497 = vmatprep.subr.bf16.mxu1 %v1776_v0  ;;  %1513 = vmatprep.mubr.msk.bf16.mxu1 %vm1785_vm1, %v1776_v0  ;;  %v990_v26 = vld [vmem:[#allocation2 + $0x200] sm:$0xff]  ;;  %v991_v27 = vld [vmem:[#allocation2 + $0x208] sm:$0xff]  ;;  %v998_v34 = vpack.c.bf16 %v987_v25, %v987_v25 }
 0xcb2   :  { %1517 = vmatprep.subr.mxu0 %v1776_v0  ;;  %1519 = vmatprep.mubr.msk.f32.mxu0 %vm1785_vm1, %v1776_v0  ;;  %v992_v28 = vld [vmem:[#allocation2 + $0x210] sm:$0xff]  ;;  %v993_v29 = vld [vmem:[#allocation2 + $0x218] sm:$0xff]  ;;  %v994_v30 = vld [vmem:[#allocation2 + $0x220] sm:$0xff] }
 0xcb3   :  { %1498 = vmatpush3.bf16.msra.mxu1 %v990_v26  ;;  %v995_v31 = vld [vmem:[#allocation2 + $0x228] sm:$0xff]  ;;  %v996_v32 = vld [vmem:[#allocation2 + $0x230] sm:$0xff]  ;;  %v997_v33 = vld [vmem:[#allocation2 + $0x238] sm:$0xff] }
 0xcb4   :  { %1499 = vmatprep.subr.bf16.mxu1 %v1776_v0  ;;  %v1208_v39 = vld [vmem:[%s2160_s2 + $0x8] ss:$0 sm:$0xff] }
 0xcb7   :  { %1500 = vmatpush3.bf16.msra.mxu1 %v991_v27 }
 0xcb8   :  { %1501 = vmatprep.subr.bf16.mxu1 %v1776_v0 }
 0xcbb   :  { %1502 = vmatpush3.bf16.msra.mxu1 %v992_v28 }
 0xcbc   :  { %1503 = vmatprep.subr.bf16.mxu1 %v1776_v0 }
 0xcbf   :  { %1504 = vmatpush3.bf16.msra.mxu1 %v993_v29 }
 0xcc0   :  { %1505 = vmatprep.subr.bf16.mxu1 %v1776_v0 }
 0xcc3   :  { %1506 = vmatpush3.bf16.msra.mxu1 %v994_v30 }
 0xcc4   :  { %1507 = vmatprep.subr.bf16.mxu1 %v1776_v0 }
 0xcc7   :  { %1508 = vmatpush3.bf16.msra.mxu1 %v995_v31 }
 0xcc8   :  { %1509 = vmatprep.subr.bf16.mxu1 %v1776_v0 }
 0xccb   :  { %1510 = vmatpush3.bf16.msra.mxu1 %v996_v32 }
 0xccc   :  { %1511 = vmatprep.subr.bf16.mxu1 %v1776_v0 }
 0xccf   :  { %1512 = vmatpush3.bf16.msra.mxu1 %v997_v33 }
 0xcd2   :  { %1514 = vmatmul.mubr.bf16.vlgmr.msra.gmra.mrb[16].mxu1 %v998_v34 }
 0xda5   :  { %v1033_v35 = vpop.f32.mrb[16].mxu1 }
 0xda6   :  { %v1515_v36 = vpop.f32.mrb[17].mxu1  ;;  %1518 = vmatpush3.msra.mxu0 %v1033_v35 }
 0xda7   :  { %v1036_v37 = vpop.f32.mrb[18].mxu1  ;;  %1520 = vmatmul.mubr.msk.f32.vlgmr.msra.gmra.mrb[26].mxu0 %vm205_vm2, %v1823_v2 }
 0xda8   :  { %v1516_v38 = vpop.f32.mrb[19].mxu1 }
 0xe7a   :  { %v1113_v40 = vpop.f32.mrb[26].mxu0 }
 0xe7b   :  { %v1114_v41 = vadd.f32 %v1208_v39, %v1113_v40  ;;  %v1521_v42 = vpop.f32.mrb[27].mxu0 }
 0xe7d   :  { %v1117_v0 = vmul.f32 0.01, %v1114_v41 }
 0xe7f   :  { %v1118_v43 = vmax.f32 %v1114_v41, %v1117_v0 }
 0xe81   :  { %1533 = vtanh.f32 %v1118_v43 }
 0xe8b   :  { %v1534_v44 = vpop.eup %1533 }
 0xe8c   :  { %1120 = vst.msk [vmem:[%s2162_s4] sm:$0xff] %vm141_vm0, %v1534_v44 }
 0xe8d   :  { %1125 = vsyncmov [#allocation3] }
 0xe90   :  { %s1126_s11 = vpop.sfrf %1125 }
 0xe91   :  { %p1210_p13 = scmp.ne.s32.totalorder %s1126_s11, 0 }
 0xe93   :  { %1130 = shalt.err (%p1210_p13)  }
 0xe94   :  { %1132 = vsyncmov [#allocation3 + $0x1] }
 0xe97   :  { %s1133_s12 = vpop.sfrf %1132 }
 0xe98   :  { %p1211_p2 = scmp.ne.s32.totalorder %s1133_s12, 0 }
 0xe9a   :  { %1137 = shalt.err (%p1211_p2)  }
 0xe9b   :  { %1139 = vsyncmov [#allocation3 + $0x2] }
 0xe9e   :  { %s1140_s2 = vpop.sfrf %1139 }
 0xe9f   :  { %p1212_p8 = scmp.ne.s32.totalorder %s1140_s2, 0 }
 0xea1   :  { %1144 = shalt.err (%p1212_p8)  }
 0xea2   :  { %1146 = vsyncmov [#allocation3 + $0x3] }
 0xea5   :  { %s1147_s13 = vpop.sfrf %1146 }
 0xea6   :  { %p1213_p9 = scmp.ne.s32.totalorder %s1147_s13, 0 }
 0xea8   :  { %1151 = shalt.err (%p1213_p9)  }
 0xea9   :  { %1153 = vsyncmov [#allocation3 + $0x4] }
 0xeac   :  { %s1154_s14 = vpop.sfrf %1153 }
 0xead   :  { %p1214_p10 = scmp.ne.s32.totalorder %s1154_s14, 0 }
 0xeaf   :  { %1158 = shalt.err (%p1214_p10)  }
 0xeb0   :  { %1160 = vsyncmov [#allocation3 + $0x5] }
 0xeb3   :  { %s1161_s4 = vpop.sfrf %1160 }
 0xeb4   :  { %p1215_p11 = scmp.ne.s32.totalorder %s1161_s4, 0 }
 0xeb6   :  { %1165 = shalt.err (%p1215_p11)  }
 0xeb7   :  { %1167 = vsyncmov [#allocation3 + $0x6] }
 0xeba   :  { %s1168_s15 = vpop.sfrf %1167 }
 0xebb   :  { %p1216_p12 = scmp.ne.s32.totalorder %s1168_s15, 0 }
 0xebd   :  { %1172 = shalt.err (%p1216_p12)  }
 0xebe   :  { %1174 = vsyncmov [#allocation3 + $0x7] }
 0xec1   :  { %s1175_s17 = vpop.sfrf %1174 }
 0xec2   :  { %p1217_p0 = scmp.ne.s32.totalorder %s1175_s17, 0 }
 0xec4   :  { %1179 = shalt.err (%p1217_p0)  }
 0xec5   :  { %1181 = vsyncmov [#allocation3 + $0x8] }
 0xec8   :  { %s1182_s18 = vpop.sfrf %1181 }
 0xec9   :  { %p1218_p1 = scmp.ne.s32.totalorder %s1182_s18, 0 }
 0xecb   :  { %1186 = shalt.err (%p1218_p1)  }

</bundles_post_ra>
